<compile_context>
chip_gen: v7x
topology: tpu7x:2x2x1
jax: 0.10.0
libtpu: 0.0.40
codegen_flags: <defaults>
</compile_context>

<pallas_src>
import jax
import jax.numpy as jnp
from jax.experimental import pallas as pl
from jax.experimental.pallas import tpu as pltpu

LANE = 128  # TPU lane width


def _round_up(n, m):
    return (n + m - 1) // m * m


def mlp_kernel(x_ref, w1_ref, b1_ref, w2_ref, b2_ref,
               w3_ref, b3_ref, w4_ref, b4_ref, o_ref):
    # Fused 4-layer MLP on one (TB, input_len) batch tile.
    # bf16 operands on the MXU, f32 accumulation, f32 bias add on the VPU.
    h = jnp.dot(x_ref[...], w1_ref[...],
                preferred_element_type=jnp.float32) + b1_ref[...]
    h = jnp.dot(h.astype(jnp.bfloat16), w2_ref[...],
                preferred_element_type=jnp.float32) + b2_ref[...]
    h = jnp.dot(h.astype(jnp.bfloat16), w3_ref[...],
                preferred_element_type=jnp.float32) + b3_ref[...]
    o_ref[...] = jnp.dot(h.astype(jnp.bfloat16), w4_ref[...],
                         preferred_element_type=jnp.float32) + b4_ref[...]


def mlp_forward(x, params, class_num, tb=512):
    """x: (B, input_len) f32.  params: bf16 weights (in,out) and f32 biases (1,out);
    the last layer is pre-padded to a lane multiple (128)."""
    B, input_len = x.shape
    n_pad = params["w4"].shape[1]                 # class_num padded to lane multiple

    # Batch tile: at least one full MXU tile (128), up to `tb` rows per step.
    TB = min(tb, _round_up(B, LANE))
    B_pad = _round_up(B, TB)

    x_bf = x.astype(jnp.bfloat16)
    if B_pad != B:
        x_bf = jnp.pad(x_bf, ((0, B_pad - B), (0, 0)))

    weight_args = (params["w1"], params["b1"],
                   params["w2"], params["b2"],
                   params["w3"], params["b3"],
                   params["w4"], params["b4"])

    # Weights/biases: full-array blocks with a constant index_map -> resident
    # in VMEM, not re-fetched per grid step.
    def resident(arr):
        return pl.BlockSpec(arr.shape, lambda i: (0, 0))

    in_specs = [pl.BlockSpec((TB, input_len), lambda i: (i, 0))]
    in_specs += [resident(a) for a in weight_args]

    flops = 2 * B_pad * (input_len * 256 + 256 * 512 + 512 * 256 + 256 * n_pad)
    bytes_accessed = int(
        x_bf.size * x_bf.dtype.itemsize
        + sum(int(a.size) * a.dtype.itemsize for a in weight_args)
        + B_pad * n_pad * 4)

    out = pl.pallas_call(
        mlp_kernel,
        out_shape=jax.ShapeDtypeStruct((B_pad, n_pad), jnp.float32),
        grid=(B_pad // TB,),
        in_specs=in_specs,
        out_specs=pl.BlockSpec((TB, n_pad), lambda i: (i, 0)),
        compiler_params=pltpu.CompilerParams(
            dimension_semantics=("parallel",)),
        cost_estimate=pl.CostEstimate(
            flops=flops, transcendentals=0, bytes_accessed=bytes_accessed),
    )(x_bf, *weight_args)

    return out[:B, :class_num]


def init_params(key, input_len, class_num, n_pad):
    """Deterministic synthetic parameters (shapes match the PyTorch module).
    Weights stored pre-transposed (in, out) in bf16; biases (1, out) in f32.
    Last layer zero-padded to n_pad output columns (lane-dense store)."""
    dims = [(input_len, 256), (256, 512), (512, 256), (256, class_num)]
    params = {}
    keys = jax.random.split(key, 2 * len(dims))
    for i, (din, dout) in enumerate(dims):
        scale = 1.0 / jnp.sqrt(jnp.float32(din))
        w = jax.random.uniform(keys[2 * i], (din, dout),
                               jnp.float32, -1.0, 1.0) * scale
        b = jax.random.uniform(keys[2 * i + 1], (1, dout),
                               jnp.float32, -1.0, 1.0) * scale
        if i == len(dims) - 1 and dout < n_pad:
            w = jnp.pad(w, ((0, 0), (0, n_pad - dout)))
            b = jnp.pad(b, ((0, 0), (0, n_pad - dout)))
        params[f"w{i + 1}"] = w.astype(jnp.bfloat16)
        params[f"b{i + 1}"] = b  # keep biases f32
    return params


def reference_forward(x, params, class_num):
    """Pure-JAX reference mirroring the kernel's numerics (bf16 operands,
    f32 accumulation)."""
    h = x.astype(jnp.bfloat16).astype(jnp.float32)
    h = h @ params["w1"].astype(jnp.float32) + params["b1"]
    for i in (2, 3, 4):
        h = (h.astype(jnp.bfloat16).astype(jnp.float32)
             @ params[f"w{i}"].astype(jnp.float32) + params[f"b{i}"])
    return h[:, :class_num]


if __name__ == "__main__":
    B, INPUT_LEN, CLASS_NUM = 8, 32, 10
    N_PAD = _round_up(CLASS_NUM, LANE)

    key = jax.random.PRNGKey(0)
    kx, kp = jax.random.split(key)
    x = jax.random.normal(kx, (B, INPUT_LEN), jnp.float32)
    params = init_params(kp, INPUT_LEN, CLASS_NUM, N_PAD)

    out = jax.block_until_ready(mlp_forward(x, params, CLASS_NUM))
    ref = reference_forward(x, params, CLASS_NUM)

    assert out.shape == (B, CLASS_NUM), out.shape
    max_err = float(jnp.max(jnp.abs(out - ref)))
    assert jnp.allclose(out, ref, atol=2e-3, rtol=2e-3), f"mismatch: {max_err}"

    print("KERNEL_OK")
</pallas_src>

<mosaic_0001>
module attributes {stable_mosaic.version = 11 : i64} {
  func.func @mlp_kernel(%arg0: i32, %arg1: memref<128x32xbf16, #tpu.memory_space<vmem>>, %arg2: memref<32x256xbf16, #tpu.memory_space<vmem>>, %arg3: memref<1x256xf32, #tpu.memory_space<vmem>>, %arg4: memref<256x512xbf16, #tpu.memory_space<vmem>>, %arg5: memref<1x512xf32, #tpu.memory_space<vmem>>, %arg6: memref<512x256xbf16, #tpu.memory_space<vmem>>, %arg7: memref<1x256xf32, #tpu.memory_space<vmem>>, %arg8: memref<256x128xbf16, #tpu.memory_space<vmem>>, %arg9: memref<1x128xf32, #tpu.memory_space<vmem>>, %arg10: memref<128x128xf32, #tpu.memory_space<vmem>>) attributes {dimension_semantics = [#tpu.dimension_semantics<parallel>], iteration_bounds = array<i64: 1>, scalar_prefetch = 0 : i64, scratch_operands = 0 : i64, tpu.core_type = #tpu.core_type<tc>, window_params = [{transform_indices = @transform_0, window_bounds = array<i64: 128, 32>}, {pipeline_mode = #tpu.pipeline_mode<synchronous>, transform_indices = @transform_1, window_bounds = array<i64: 32, 256>}, {pipeline_mode = #tpu.pipeline_mode<synchronous>, transform_indices = @transform_2, window_bounds = array<i64: 1, 256>}, {pipeline_mode = #tpu.pipeline_mode<synchronous>, transform_indices = @transform_3, window_bounds = array<i64: 256, 512>}, {pipeline_mode = #tpu.pipeline_mode<synchronous>, transform_indices = @transform_4, window_bounds = array<i64: 1, 512>}, {pipeline_mode = #tpu.pipeline_mode<synchronous>, transform_indices = @transform_5, window_bounds = array<i64: 512, 256>}, {pipeline_mode = #tpu.pipeline_mode<synchronous>, transform_indices = @transform_6, window_bounds = array<i64: 1, 256>}, {pipeline_mode = #tpu.pipeline_mode<synchronous>, transform_indices = @transform_7, window_bounds = array<i64: 256, 128>}, {pipeline_mode = #tpu.pipeline_mode<synchronous>, transform_indices = @transform_8, window_bounds = array<i64: 1, 128>}, {transform_indices = @transform_9, window_bounds = array<i64: 128, 128>}]} {
    %c0 = arith.constant 0 : index
    %c0_0 = arith.constant 0 : index
    %0 = vector.load %arg1[%c0, %c0_0] : memref<128x32xbf16, #tpu.memory_space<vmem>>, vector<128x32xbf16>
    %c0_1 = arith.constant 0 : index
    %c0_2 = arith.constant 0 : index
    %1 = vector.load %arg2[%c0_1, %c0_2] : memref<32x256xbf16, #tpu.memory_space<vmem>>, vector<32x256xbf16>
    %cst = arith.constant dense<0.000000e+00> : vector<128x256xf32>
    %2 = tpu.matmul %0, %1, %cst {dimension_numbers = #tpu.dot_dimension_numbers<[1], [0], [0], [1], [0, 0, 1, 1], [], []>} : vector<128x32xbf16>, vector<32x256xbf16>, vector<128x256xf32> -> vector<128x256xf32>
    %c0_3 = arith.constant 0 : index
    %c0_4 = arith.constant 0 : index
    %3 = vector.load %arg3[%c0_3, %c0_4] : memref<1x256xf32, #tpu.memory_space<vmem>>, vector<1x256xf32>
    %4 = vector.broadcast %3 : vector<1x256xf32> to vector<128x256xf32>
    %5 = arith.addf %2, %4 : vector<128x256xf32>
    %6 = arith.truncf %5 : vector<128x256xf32> to vector<128x256xbf16>
    %c0_5 = arith.constant 0 : index
    %c0_6 = arith.constant 0 : index
    %7 = vector.load %arg4[%c0_5, %c0_6] : memref<256x512xbf16, #tpu.memory_space<vmem>>, vector<256x512xbf16>
    %cst_7 = arith.constant dense<0.000000e+00> : vector<128x512xf32>
    %8 = tpu.matmul %6, %7, %cst_7 {dimension_numbers = #tpu.dot_dimension_numbers<[1], [0], [0], [1], [0, 0, 1, 1], [], []>} : vector<128x256xbf16>, vector<256x512xbf16>, vector<128x512xf32> -> vector<128x512xf32>
    %c0_8 = arith.constant 0 : index
    %c0_9 = arith.constant 0 : index
    %9 = vector.load %arg5[%c0_8, %c0_9] : memref<1x512xf32, #tpu.memory_space<vmem>>, vector<1x512xf32>
    %10 = vector.broadcast %9 : vector<1x512xf32> to vector<128x512xf32>
    %11 = arith.addf %8, %10 : vector<128x512xf32>
    %12 = arith.truncf %11 : vector<128x512xf32> to vector<128x512xbf16>
    %c0_10 = arith.constant 0 : index
    %c0_11 = arith.constant 0 : index
    %13 = vector.load %arg6[%c0_10, %c0_11] : memref<512x256xbf16, #tpu.memory_space<vmem>>, vector<512x256xbf16>
    %cst_12 = arith.constant dense<0.000000e+00> : vector<128x256xf32>
    %14 = tpu.matmul %12, %13, %cst_12 {dimension_numbers = #tpu.dot_dimension_numbers<[1], [0], [0], [1], [0, 0, 1, 1], [], []>} : vector<128x512xbf16>, vector<512x256xbf16>, vector<128x256xf32> -> vector<128x256xf32>
    %c0_13 = arith.constant 0 : index
    %c0_14 = arith.constant 0 : index
    %15 = vector.load %arg7[%c0_13, %c0_14] : memref<1x256xf32, #tpu.memory_space<vmem>>, vector<1x256xf32>
    %16 = vector.broadcast %15 : vector<1x256xf32> to vector<128x256xf32>
    %17 = arith.addf %14, %16 : vector<128x256xf32>
    %18 = arith.truncf %17 : vector<128x256xf32> to vector<128x256xbf16>
    %c0_15 = arith.constant 0 : index
    %c0_16 = arith.constant 0 : index
    %19 = vector.load %arg8[%c0_15, %c0_16] : memref<256x128xbf16, #tpu.memory_space<vmem>>, vector<256x128xbf16>
    %cst_17 = arith.constant dense<0.000000e+00> : vector<128x128xf32>
    %20 = tpu.matmul %18, %19, %cst_17 {dimension_numbers = #tpu.dot_dimension_numbers<[1], [0], [0], [1], [0, 0, 1, 1], [], []>} : vector<128x256xbf16>, vector<256x128xbf16>, vector<128x128xf32> -> vector<128x128xf32>
    %c0_18 = arith.constant 0 : index
    %c0_19 = arith.constant 0 : index
    %21 = vector.load %arg9[%c0_18, %c0_19] : memref<1x128xf32, #tpu.memory_space<vmem>>, vector<1x128xf32>
    %22 = vector.broadcast %21 : vector<1x128xf32> to vector<128x128xf32>
    %23 = arith.addf %20, %22 : vector<128x128xf32>
    %c0_20 = arith.constant 0 : index
    %c0_21 = arith.constant 0 : index
    %24 = vector.load %arg10[%c0_20, %c0_21] : memref<128x128xf32, #tpu.memory_space<vmem>>, vector<128x128xf32>
    tpu.vector_store %arg10[%c0_20, %c0_21], %23 {strides = array<i32>} : memref<128x128xf32, #tpu.memory_space<vmem>>, vector<128x128xf32>,
    return
  }
  func.func @transform_0(%arg0: i32) -> (i32, i32) {
    %c0_i32 = arith.constant 0 : i32
    %c0_i32_0 = arith.constant 0 : i32
    return %arg0, %c0_i32 : i32, i32
  }
  func.func @transform_1(%arg0: i32) -> (i32, i32) {
    %c0_i32 = arith.constant 0 : i32
    %c0_i32_0 = arith.constant 0 : i32
    %c0_i32_1 = arith.constant 0 : i32
    return %c0_i32, %c0_i32_0 : i32, i32
  }
  func.func @transform_2(%arg0: i32) -> (i32, i32) {
    %c0_i32 = arith.constant 0 : i32
    %c0_i32_0 = arith.constant 0 : i32
    %c0_i32_1 = arith.constant 0 : i32
    return %c0_i32, %c0_i32_0 : i32, i32
  }
  func.func @transform_3(%arg0: i32) -> (i32, i32) {
    %c0_i32 = arith.constant 0 : i32
    %c0_i32_0 = arith.constant 0 : i32
    %c0_i32_1 = arith.constant 0 : i32
    return %c0_i32, %c0_i32_0 : i32, i32
  }
  func.func @transform_4(%arg0: i32) -> (i32, i32) {
    %c0_i32 = arith.constant 0 : i32
    %c0_i32_0 = arith.constant 0 : i32
    %c0_i32_1 = arith.constant 0 : i32
    return %c0_i32, %c0_i32_0 : i32, i32
  }
  func.func @transform_5(%arg0: i32) -> (i32, i32) {
    %c0_i32 = arith.constant 0 : i32
    %c0_i32_0 = arith.constant 0 : i32
    %c0_i32_1 = arith.constant 0 : i32
    return %c0_i32, %c0_i32_0 : i32, i32
  }
  func.func @transform_6(%arg0: i32) -> (i32, i32) {
    %c0_i32 = arith.constant 0 : i32
    %c0_i32_0 = arith.constant 0 : i32
    %c0_i32_1 = arith.constant 0 : i32
    return %c0_i32, %c0_i32_0 : i32, i32
  }
  func.func @transform_7(%arg0: i32) -> (i32, i32) {
    %c0_i32 = arith.constant 0 : i32
    %c0_i32_0 = arith.constant 0 : i32
    %c0_i32_1 = arith.constant 0 : i32
    return %c0_i32, %c0_i32_0 : i32, i32
  }
  func.func @transform_8(%arg0: i32) -> (i32, i32) {
    %c0_i32 = arith.constant 0 : i32
    %c0_i32_0 = arith.constant 0 : i32
    %c0_i32_1 = arith.constant 0 : i32
    return %c0_i32, %c0_i32_0 : i32, i32
  }
  func.func @transform_9(%arg0: i32) -> (i32, i32) {
    %c0_i32 = arith.constant 0 : i32
    %c0_i32_0 = arith.constant 0 : i32
    return %arg0, %c0_i32 : i32, i32
  }
}

</mosaic_0001>

<bundles_post_ra>
// kernel: tpu_custom_call.1
= control target key start
LH: loop header
LB: loop body
LE: loop exit
PB: predicated region body
PF: predicated region fallthrough
CT: control target
= control target key end

     0   :  { %14 = vsyncpa [#allocation3], 0  ;;  %s2980_s0 = inlined_call_operand.vmem [shape: bf16[128,32], index: 0, kind: input, shape index: {}]   ;;  %s2981_s1 = inlined_call_operand.vmem [shape: bf16[32,256], index: 1, kind: input, shape index: {}]   ;;  %s2982_s2 = inlined_call_operand.vmem [shape: f32[1,256], index: 2, kind: input, shape index: {}]   ;;  %s2983_s3 = inlined_call_operand.hbm [shape: bf16[256,512], index: 3, kind: input, shape index: {}]   ;;  %s2984_s4 = inlined_call_operand.vmem [shape: f32[1,512], index: 4, kind: input, shape index: {}]   ;;  %s2985_s5 = inlined_call_operand.hbm [shape: bf16[512,256], index: 5, kind: input, shape index: {}]   ;;  %s2986_s6 = inlined_call_operand.vmem [shape: f32[1,256], index: 6, kind: input, shape index: {}]   ;;  %s2987_s7 = inlined_call_operand.hbm [shape: bf16[256,128], index: 7, kind: input, shape index: {}]   ;;  %s2988_s8 = inlined_call_operand.vmem [shape: f32[1,128], index: 8, kind: input, shape index: {}]   ;;  %s2989_s9 = inlined_call_operand.hbm [shape: f32[128,128], index: 9, kind: output, shape index: {}]  }
   0x1   :  { %15 = vsyncpa [#allocation6], 0 }
   0x2   :  { %16 = vsyncpa [#allocation4], 0  ;;  %s2509_s30 = smov [#allocation5]   ;;  %s2415_s13 = scalar_lea.hbm %s2985_s5, 8192 }
   0x3   :  { %s42_s10 = sshll.u32 %s2509_s30, 4  ;;  %p2416_p0 = scmp.ne.s32.totalorder %s2985_s5, %s2415_s13  ;;  %s43_s10 = int_to_ptr.vmem [resolvable:$true] %s42_s10 }
   0x4   :  { %p2419_p1 = scmp.lt.u32.totalorder %s2415_s13, %s2985_s5 }
   0x6   :  { %p2421_p2 = pnand %p2419_p1, %p2416_p0 }
   0x8   :  { %2424 = shalt.err (!%p2421_p2)
}
   0x9   :  { %s2425_s18 = scalar_lea.vmem %s43_s10, 8192  ;;  %p2430_p4 = scmp.lt.s32.totalorder %s43_s10, %s43_s10 }
   0xa   :  { %p2426_p3 = scmp.ne.s32.totalorder %s43_s10, %s2425_s18  ;;  %p2431_p5 = scmp.lt.s32.totalorder %s2425_s18, %s2425_s18 }
   0xc   :  { %p2432_p6 = por %p2431_p5, %p2430_p4 }
   0xe   :  { %p2433_p7 = pnand %p2432_p6, %p2426_p3 }
  0x10   :  { %2436 = shalt.err (!%p2433_p7)
}
  0x11   :  { %s2510_s19 = smov 128   ;;  %s2511_s20 = smov 8  }
  0x12   :  { %48 = dma.hbm_to_vmem [thread:$0]  %s2985_s5, 8192, %s43_s10, [#allocation6], %s2510_s19, %s2510_s19, %s2511_s20  }
  0x13   :  { %s2512_s23 = smov [#allocation2]   ;;  %s2437_s27 = scalar_lea.hbm %s2983_s3, 8192 }
  0x14   :  { %s28_s24 = sshll.u32 %s2512_s23, 4  ;;  %p2438_p8 = scmp.ne.s32.totalorder %s2983_s3, %s2437_s27  ;;  %s29_s24 = int_to_ptr.vmem [resolvable:$true] %s28_s24 }
  0x15   :  { %p2441_p9 = scmp.lt.u32.totalorder %s2437_s27, %s2983_s3 }
  0x17   :  { %p2443_p10 = pnand %p2441_p9, %p2438_p8 }
  0x19   :  { %2446 = shalt.err (!%p2443_p10)
}
  0x1a   :  { %s2447_s12 = scalar_lea.vmem %s29_s24, 8192  ;;  %p2452_p12 = scmp.lt.s32.totalorder %s29_s24, %s29_s24 }
  0x1b   :  { %p2448_p11 = scmp.ne.s32.totalorder %s29_s24, %s2447_s12  ;;  %p2453_p13 = scmp.lt.s32.totalorder %s2447_s12, %s2447_s12 }
  0x1d   :  { %p2454_p0 = por %p2453_p13, %p2452_p12 }
  0x1f   :  { %p2455_p1 = pnand %p2454_p0, %p2448_p11 }
  0x21   :  { %2458 = shalt.err (!%p2455_p1)
}
  0x22   :  { %s2513_s5 = smov 256   ;;  %s2514_s10 = smov 16  }
  0x23   :  { %34 = dma.hbm_to_vmem [thread:$0]  %s2983_s3, 8192, %s29_s24, [#allocation3], %s2513_s5, %s2513_s5, %s2514_s10  }
  0x24   :  { %s2515_s15 = smov [#allocation7]   ;;  %s2459_s21 = scalar_lea.hbm %s2987_s7, 2048 }
  0x25   :  { %s56_s16 = sshll.u32 %s2515_s15, 4  ;;  %p2460_p2 = scmp.ne.s32.totalorder %s2987_s7, %s2459_s21  ;;  %s57_s16 = int_to_ptr.vmem [resolvable:$true] %s56_s16 }
  0x26   :  { %p2463_p3 = scmp.lt.u32.totalorder %s2459_s21, %s2987_s7 }
  0x28   :  { %p2465_p4 = pnand %p2463_p3, %p2460_p2 }
  0x2a   :  { %2468 = shalt.err (!%p2465_p4)
}
  0x2b   :  { %s2469_s27 = scalar_lea.vmem %s57_s16, 2048  ;;  %p2474_p6 = scmp.lt.s32.totalorder %s57_s16, %s57_s16 }
  0x2c   :  { %p2470_p5 = scmp.ne.s32.totalorder %s57_s16, %s2469_s27  ;;  %p2475_p7 = scmp.lt.s32.totalorder %s2469_s27, %s2469_s27 }
  0x2e   :  { %p2476_p8 = por %p2475_p7, %p2474_p6 }
  0x30   :  { %p2477_p9 = pnand %p2476_p8, %p2470_p5 }
  0x32   :  { %2480 = shalt.err (!%p2477_p9)
}
  0x33   :  { %s2516_s3 = smov 64   ;;  %s2517_s24 = smov 4  }
  0x34   :  { %62 = dma.hbm_to_vmem [thread:$0]  %s2987_s7, 2048, %s57_s16, [#allocation6], %s2516_s3, %s2516_s3, %s2517_s24  }
  0x35   :  { %2503 = dma.done.wait [#allocation3], 8192  }
  0x36   :  { %2504 = vsyncadd [#allocation3], 4294959104 }
  0x37   :  { %2505 = dma.done.wait [#allocation6], 10240  }
  0x38   :  { %2506 = vsyncadd [#allocation6], 4294957056  ;;  %v2518_v0 = vmov 0   ;;  %v2193_v1 = vld [vmem:[%s2981_s1 + $0x4] ss:$8 sps:$4 sm:$0xff]   ;;  %vm167_vm0 = vcmask 261120  }
  0x39   :  { %224 = vmatprep.mubr.bf16.mxu0 %v2518_v0  ;;  %v2195_v2 = vld [vmem:[%s2981_s1] ss:$8 sps:$4 sm:$0xff]   ;;  %192 = vmatprep.subr.bf16.mxu0 %v2193_v1  ;;  %v2196_v3 = vld [vmem:[%s2981_s1 + $0x14] ss:$8 sps:$4 sm:$0xff]   ;;  %v2198_v4 = vld [vmem:[%s2981_s1 + $0x10] ss:$8 sps:$4 sm:$0xff]  }
  0x3a   :  { %193 = vmatpush1.bf16.msra.mxu0 %v2195_v2  ;;  %v2199_v5 = vld [vmem:[%s2980_s0] sm:$0xff]   ;;  %v2200_v7 = vld [vmem:[%s2980_s0 + $0x8] sm:$0xff]   ;;  %v2201_v21 = vld [vmem:[%s2980_s0 + $0x10] sm:$0xff]  }
  0x3b   :  { %194 = vmatprep.subr.bf16.mxu0 %v2196_v3  ;;  %v2207_v6 = vld [vmem:[#allocation2 + $0x4] ss:$16 sps:$4 sm:$0xff]   ;;  %v2209_v8 = vld [vmem:[#allocation2 + $0x8] ss:$16 sps:$4 sm:$0xff]   ;;  %v2211_v9 = vld [vmem:[#allocation2 + $0xc] ss:$16 sps:$4 sm:$0xff]  }
  0x3c   :  { %727 = vmatprep.subr.bf16.mxu1 %v2207_v6  ;;  %v2212_v10 = vld [vmem:[#allocation2] ss:$16 sps:$4 sm:$0xff]   ;;  %v2213_v11 = vld [vmem:[#allocation2 + $0x24] ss:$16 sps:$4 sm:$0xff]   ;;  %v2215_v12 = vld [vmem:[#allocation2 + $0x28] ss:$16 sps:$4 sm:$0xff]  }
  0x3d   :  { %728 = vmatpush1.bf16.msra.mxu1 %v2212_v10  ;;  %v2217_v13 = vld [vmem:[#allocation2 + $0x2c] ss:$16 sps:$4 sm:$0xff]   ;;  %v2218_v14 = vld [vmem:[#allocation2 + $0x20] ss:$16 sps:$4 sm:$0xff]   ;;  %v2219_v15 = vld [vmem:[#allocation2 + $0x44] ss:$16 sps:$4 sm:$0xff]  }
  0x3e   :  { %195 = vmatpush1.bf16.msra.mxu0 %v2198_v4  ;;  %729 = vmatprep.subr.bf16.mxu1 %v2213_v11  ;;  %v2223_v16 = vld [vmem:[#allocation2 + $0x4c] ss:$16 sps:$4 sm:$0xff]   ;;  %v2224_v17 = vld [vmem:[#allocation2 + $0x40] ss:$16 sps:$4 sm:$0xff]   ;;  %v2221_v18 = vld [vmem:[#allocation2 + $0x48] ss:$16 sps:$4 sm:$0xff]  }
  0x3f   :  { %840 = vmatprep.subr.bf16.mxu0 %v2211_v9  ;;  %v2225_v19 = vld [vmem:[#allocation2 + $0x64] ss:$16 sps:$4 sm:$0xff]   ;;  %v2229_v20 = vld [vmem:[#allocation2 + $0x6c] ss:$16 sps:$4 sm:$0xff]   ;;  %v2227_v22 = vld [vmem:[#allocation2 + $0x68] ss:$16 sps:$4 sm:$0xff]  }
  0x40   :  { %v2230_v23 = vld [vmem:[#allocation2 + $0x60] ss:$16 sps:$4 sm:$0xff]   ;;  %v2231_v24 = vld [vmem:[#allocation2 + $0x84] ss:$16 sps:$4 sm:$0xff]   ;;  %v2235_v25 = vld [vmem:[#allocation2 + $0x8c] ss:$16 sps:$4 sm:$0xff]  }
  0x41   :  { %1901 = vmatmul.mubr.msk.bf16.vlgmr.msra.gmra.mrb[0].mxu0 %vm167_vm0, %v2199_v5  ;;  %730 = vmatpush1.bf16.msra.mxu1 %v2218_v14  ;;  %v2236_v26 = vld [vmem:[#allocation2 + $0x80] ss:$16 sps:$4 sm:$0xff]   ;;  %v2233_v27 = vld [vmem:[#allocation2 + $0x88] ss:$16 sps:$4 sm:$0xff]   ;;  %v2237_v28 = vld [vmem:[#allocation2 + $0xa4] ss:$16 sps:$4 sm:$0xff]   ;;  %v97_v14 = vlaneseq }
  0x42   :  { %234 = vmatprep.mubr.bf16.mxu0 %v2518_v0  ;;  %841 = vmatpush1.bf16.msra.mxu0 %v2209_v8  ;;  %v2241_v29 = vld [vmem:[#allocation2 + $0xac] ss:$16 sps:$4 sm:$0xff]   ;;  %v2239_v31 = vld [vmem:[#allocation2 + $0xa8] ss:$16 sps:$4 sm:$0xff]   ;;  %v2242_v32 = vld [vmem:[#allocation2 + $0xa0] ss:$16 sps:$4 sm:$0xff]  }
  0x43   :  { %842 = vmatprep.subr.bf16.mxu0 %v2217_v13  ;;  %731 = vmatprep.subr.bf16.mxu1 %v2219_v15  ;;  %v2202_v30 = vld [vmem:[%s2980_s0 + $0x18] sm:$0xff]   ;;  %v2243_v33 = vld [vmem:[#allocation2 + $0xc4] ss:$16 sps:$4 sm:$0xff]   ;;  %v2248_v35 = vld [vmem:[#allocation2 + $0xc0] ss:$16 sps:$4 sm:$0xff]   ;;  %v2661_v15 = vshrl.u32 %v97_v14, 7 }
  0x44   :  { %v2247_v34 = vld [vmem:[#allocation2 + $0xcc] ss:$16 sps:$4 sm:$0xff]   ;;  %v2245_v36 = vld [vmem:[#allocation2 + $0xc8] ss:$16 sps:$4 sm:$0xff]   ;;  %v2249_v37 = vld [vmem:[#allocation2 + $0xe4] ss:$16 sps:$4 sm:$0xff]  }
  0x45   :  { %732 = vmatpush1.bf16.msra.mxu1 %v2224_v17  ;;  %v2253_v38 = vld [vmem:[#allocation2 + $0xec] ss:$16 sps:$4 sm:$0xff]   ;;  %v2203_v39 = vld [vmem:[%s2980_s0 + $0x20] sm:$0xff]   ;;  %v2251_v40 = vld [vmem:[#allocation2 + $0xe8] ss:$16 sps:$4 sm:$0xff]  }
  0x46   :  { %843 = vmatpush1.bf16.msra.mxu0 %v2215_v12  ;;  %733 = vmatprep.subr.bf16.mxu1 %v2225_v19  ;;  %v2254_v41 = vld [vmem:[#allocation2 + $0xe0] ss:$16 sps:$4 sm:$0xff]   ;;  %v2255_v42 = vld [vmem:[#allocation2 + $0x104] ss:$16 sps:$4 sm:$0xff]   ;;  %v2259_v43 = vld [vmem:[#allocation2 + $0x10c] ss:$16 sps:$4 sm:$0xff]  }
  0x47   :  { %844 = vmatprep.subr.bf16.mxu0 %v2223_v16  ;;  %v2260_v44 = vld [vmem:[#allocation2 + $0x100] ss:$16 sps:$4 sm:$0xff]   ;;  %v2257_v45 = vld [vmem:[#allocation2 + $0x108] ss:$16 sps:$4 sm:$0xff]   ;;  %v2261_v46 = vld [vmem:[#allocation2 + $0x124] ss:$16 sps:$4 sm:$0xff]  }
  0x48   :  { %v2265_v47 = vld [vmem:[#allocation2 + $0x12c] ss:$16 sps:$4 sm:$0xff]   ;;  %v2263_v49 = vld [vmem:[#allocation2 + $0x128] ss:$16 sps:$4 sm:$0xff]   ;;  %v2266_v50 = vld [vmem:[#allocation2 + $0x120] ss:$16 sps:$4 sm:$0xff]  }
  0x49   :  { %1902 = vmatmul.mubr.msk.bf16.gmra.mrb[4].mxu0 %vm167_vm0, %v2200_v7  ;;  %734 = vmatpush1.bf16.msra.mxu1 %v2230_v23  ;;  %v2204_v48 = vld [vmem:[%s2980_s0 + $0x28] sm:$0xff]   ;;  %v2267_v51 = vld [vmem:[#allocation2 + $0x144] ss:$16 sps:$4 sm:$0xff]   ;;  %v2272_v53 = vld [vmem:[#allocation2 + $0x140] ss:$16 sps:$4 sm:$0xff]   ;;  %v2664_v16 = vsub.s32 0, %v2661_v15 }
  0x4a   :  { %244 = vmatprep.mubr.bf16.mxu0 %v2518_v0  ;;  %845 = vmatpush1.bf16.msra.mxu0 %v2221_v18  ;;  %v2271_v52 = vld [vmem:[#allocation2 + $0x14c] ss:$16 sps:$4 sm:$0xff]   ;;  %v2269_v54 = vld [vmem:[#allocation2 + $0x148] ss:$16 sps:$4 sm:$0xff]   ;;  %v2273_v55 = vld [vmem:[#allocation2 + $0x164] ss:$16 sps:$4 sm:$0xff]  }
  0x4b   :  { %846 = vmatprep.subr.bf16.mxu0 %v2229_v20  ;;  %735 = vmatprep.subr.bf16.mxu1 %v2231_v24  ;;  %v2277_v56 = vld [vmem:[#allocation2 + $0x16c] ss:$16 sps:$4 sm:$0xff]   ;;  %v2205_v57 = vld [vmem:[%s2980_s0 + $0x30] sm:$0xff]   ;;  %v2275_v59 = vld [vmem:[#allocation2 + $0x168] ss:$16 sps:$4 sm:$0xff]   ;;  %v2670_v18 = vsub.s32 1, %v2661_v15 }
  0x4c   :  { %v2278_v58 = vld [vmem:[#allocation2 + $0x160] ss:$16 sps:$4 sm:$0xff]   ;;  %v2279_v60 = vld [vmem:[#allocation2 + $0x184] ss:$16 sps:$4 sm:$0xff]   ;;  %v2283_v61 = vld [vmem:[#allocation2 + $0x18c] ss:$16 sps:$4 sm:$0xff]  }
  0x4d   :  { %736 = vmatpush1.bf16.msra.mxu1 %v2236_v26  ;;  %v2284_v62 = vld [vmem:[#allocation2 + $0x180] ss:$16 sps:$4 sm:$0xff]   ;;  %v2281_v63 = vld [vmem:[#allocation2 + $0x188] ss:$16 sps:$4 sm:$0xff]   ;;  %v2285_v1 = vld [vmem:[#allocation2 + $0x1a4] ss:$16 sps:$4 sm:$0xff]  }
  0x4e   :  { %847 = vmatpush1.bf16.msra.mxu0 %v2227_v22  ;;  %737 = vmatprep.subr.bf16.mxu1 %v2237_v28  ;;  %v2289_v2 = vld [vmem:[#allocation2 + $0x1ac] ss:$16 sps:$4 sm:$0xff]   ;;  %v2290_v4 = vld [vmem:[#allocation2 + $0x1a0] ss:$16 sps:$4 sm:$0xff]   ;;  %v2287_v5 = vld [vmem:[#allocation2 + $0x1a8] ss:$16 sps:$4 sm:$0xff]  }
  0x4f   :  { %848 = vmatprep.subr.bf16.mxu0 %v2235_v25  ;;  %v2206_v3 = vld [vmem:[%s2980_s0 + $0x38] sm:$0xff]   ;;  %v2296_v8 = vld [vmem:[#allocation2 + $0x1c0] ss:$16 sps:$4 sm:$0xff]   ;;  %v2297_v9 = vld [vmem:[#allocation2 + $0x1e4] ss:$16 sps:$4 sm:$0xff]  }
  0x50   :  { %v2295_v6 = vld [vmem:[#allocation2 + $0x1cc] ss:$16 sps:$4 sm:$0xff]   ;;  %v2293_v7 = vld [vmem:[#allocation2 + $0x1c8] ss:$16 sps:$4 sm:$0xff]   ;;  %v2302_v12 = vld [vmem:[#allocation2 + $0x1e0] ss:$16 sps:$4 sm:$0xff]  }
  0x51   :  { %1903 = vmatmul.mubr.msk.bf16.gmra.mrb[8].mxu0 %vm167_vm0, %v2201_v21  ;;  %738 = vmatpush1.bf16.msra.mxu1 %v2242_v32  ;;  %v2301_v10 = vld [vmem:[#allocation2 + $0x1ec] ss:$16 sps:$4 sm:$0xff]   ;;  %v2299_v11 = vld [vmem:[#allocation2 + $0x1e8] ss:$16 sps:$4 sm:$0xff]   ;;  %v95_v17 = vld [vmem:[%s2982_s2] sm:$0x3] }
  0x52   :  { %254 = vmatprep.mubr.bf16.mxu0 %v2518_v0  ;;  %849 = vmatpush1.bf16.msra.mxu0 %v2233_v27  ;;  %v2305_v13 = vld [vmem:[#allocation5 + $0x4] ss:$8 sps:$4 sm:$0xff]   ;;  %v2673_v19 = vrot.slane %v95_v17, %v2664_v16  ;;  %v2676_v21 = vrot.slane %v95_v17, %v2670_v18  ;;  %v2308_v32 = vld [vmem:[#allocation5 + $0x14] ss:$8 sps:$4 sm:$0xff]   ;;  %v2324_v14 = vld [vmem:[#allocation5 + $0x70] ss:$8 sps:$4 sm:$0xff]  }
  0x53   :  { %850 = vmatprep.subr.bf16.mxu0 %v2241_v29  ;;  %739 = vmatprep.subr.bf16.mxu1 %v2243_v33 }
  0x55   :  { %740 = vmatpush1.bf16.msra.mxu1 %v2248_v35 }
  0x56   :  { %851 = vmatpush1.bf16.msra.mxu0 %v2239_v31  ;;  %741 = vmatprep.subr.bf16.mxu1 %v2249_v37  ;;  %v2303_v31 = vld [vmem:[#allocation5] ss:$8 sps:$4 sm:$0xff]  }
  0x57   :  { %852 = vmatprep.subr.bf16.mxu0 %v2247_v34 }
  0x59   :  { %1904 = vmatmul.mubr.msk.bf16.gmra.mrb[12].mxu0 %vm167_vm0, %v2202_v30  ;;  %742 = vmatpush1.bf16.msra.mxu1 %v2254_v41 }
  0x5a   :  { %264 = vmatprep.mubr.bf16.mxu0 %v2518_v0  ;;  %853 = vmatpush1.bf16.msra.mxu0 %v2245_v36  ;;  %v2306_v36 = vld [vmem:[#allocation5 + $0x10] ss:$8 sps:$4 sm:$0xff]  }
  0x5b   :  { %854 = vmatprep.subr.bf16.mxu0 %v2253_v38  ;;  %743 = vmatprep.subr.bf16.mxu1 %v2255_v42 }
  0x5d   :  { %744 = vmatpush1.bf16.msra.mxu1 %v2260_v44 }
  0x5e   :  { %855 = vmatpush1.bf16.msra.mxu0 %v2251_v40  ;;  %745 = vmatprep.subr.bf16.mxu1 %v2261_v46  ;;  %v2311_v40 = vld [vmem:[#allocation5 + $0x24] ss:$8 sps:$4 sm:$0xff]   ;;  %v2314_v46 = vld [vmem:[#allocation5 + $0x34] ss:$8 sps:$4 sm:$0xff]  }
  0x5f   :  { %856 = vmatprep.subr.bf16.mxu0 %v2259_v43 }
  0x61   :  { %1905 = vmatmul.mubr.msk.bf16.gmra.mrb[16].mxu0 %vm167_vm0, %v2203_v39  ;;  %746 = vmatpush1.bf16.msra.mxu1 %v2266_v50  ;;  %v2312_v50 = vld [vmem:[#allocation5 + $0x30] ss:$8 sps:$4 sm:$0xff]  }
  0x62   :  { %274 = vmatprep.mubr.bf16.mxu0 %v2518_v0  ;;  %857 = vmatpush1.bf16.msra.mxu0 %v2257_v45  ;;  %v2309_v45 = vld [vmem:[#allocation5 + $0x20] ss:$8 sps:$4 sm:$0xff]  }
  0x63   :  { %858 = vmatprep.subr.bf16.mxu0 %v2265_v47  ;;  %747 = vmatprep.subr.bf16.mxu1 %v2267_v51 }
  0x65   :  { %748 = vmatpush1.bf16.msra.mxu1 %v2272_v53 }
  0x66   :  { %859 = vmatpush1.bf16.msra.mxu0 %v2263_v49  ;;  %749 = vmatprep.subr.bf16.mxu1 %v2273_v55 }
  0x67   :  { %860 = vmatprep.subr.bf16.mxu0 %v2271_v52 }
  0x69   :  { %1906 = vmatmul.mubr.msk.bf16.gmra.mrb[20].mxu0 %vm167_vm0, %v2204_v48  ;;  %750 = vmatpush1.bf16.msra.mxu1 %v2278_v58 }
  0x6a   :  { %284 = vmatprep.mubr.bf16.mxu0 %v2518_v0  ;;  %861 = vmatpush1.bf16.msra.mxu0 %v2269_v54  ;;  %v2317_v54 = vld [vmem:[#allocation5 + $0x44] ss:$8 sps:$4 sm:$0xff]  }
  0x6b   :  { %862 = vmatprep.subr.bf16.mxu0 %v2277_v56  ;;  %751 = vmatprep.subr.bf16.mxu1 %v2279_v60  ;;  %v2320_v60 = vld [vmem:[#allocation5 + $0x54] ss:$8 sps:$4 sm:$0xff]  }
  0x6d   :  { %752 = vmatpush1.bf16.msra.mxu1 %v2284_v62 }
  0x6e   :  { %863 = vmatpush1.bf16.msra.mxu0 %v2275_v59  ;;  %753 = vmatprep.subr.bf16.mxu1 %v2285_v1  ;;  %v2315_v59 = vld [vmem:[#allocation5 + $0x40] ss:$8 sps:$4 sm:$0xff]   ;;  %v2318_v1 = vld [vmem:[#allocation5 + $0x50] ss:$8 sps:$4 sm:$0xff]  }
  0x6f   :  { %864 = vmatprep.subr.bf16.mxu0 %v2283_v61 }
  0x71   :  { %1907 = vmatmul.mubr.msk.bf16.gmra.mrb[24].mxu0 %vm167_vm0, %v2205_v57  ;;  %754 = vmatpush1.bf16.msra.mxu1 %v2290_v4 }
  0x72   :  { %294 = vmatprep.mubr.bf16.mxu0 %v2518_v0  ;;  %865 = vmatpush1.bf16.msra.mxu0 %v2281_v63  ;;  %v2291_v0 = vld [vmem:[#allocation2 + $0x1c4] ss:$16 sps:$4 sm:$0xff]  }
  0x73   :  { %866 = vmatprep.subr.bf16.mxu0 %v2289_v2  ;;  %755 = vmatprep.subr.bf16.mxu1 %v2291_v0 }
  0x75   :  { %756 = vmatpush1.bf16.msra.mxu1 %v2296_v8 }
  0x76   :  { %867 = vmatpush1.bf16.msra.mxu0 %v2287_v5  ;;  %757 = vmatprep.subr.bf16.mxu1 %v2297_v9  ;;  %v2323_v5 = vld [vmem:[#allocation5 + $0x64] ss:$8 sps:$4 sm:$0xff]   ;;  %v2321_v9 = vld [vmem:[#allocation5 + $0x60] ss:$8 sps:$4 sm:$0xff]  }
  0x77   :  { %868 = vmatprep.subr.bf16.mxu0 %v2295_v6 }
  0x79   :  { %1908 = vmatmul.mubr.msk.bf16.gmra.mrb[28].mxu0 %vm167_vm0, %v2206_v3  ;;  %758 = vmatpush1.bf16.msra.mxu1 %v2302_v12 }
  0x7a   :  { %869 = vmatpush1.bf16.msra.mxu0 %v2293_v7  ;;  %1381 = vmatprep.subr.bf16.mxu1 %v2305_v13 }
  0x7b   :  { %870 = vmatprep.subr.bf16.mxu0 %v2301_v10  ;;  %v2326_v10 = vld [vmem:[#allocation5 + $0x74] ss:$8 sps:$4 sm:$0xff]  }
  0x7e   :  { %871 = vmatpush1.bf16.msra.mxu0 %v2299_v11 }
 0x114   :  { %v226_v20 = vpop.f32.mrb[0].mxu0 }
 0x115   :  { %v228_v22 = vpop.f32.mrb[1].mxu0  ;;  %v227_v24 = vadd.f32 %v226_v20, %v2673_v19 }
 0x116   :  { %v230_v23 = vpop.f32.mrb[2].mxu0  ;;  %v229_v27 = vadd.f32 %v228_v22, %v2676_v21 }
 0x117   :  { %v231_v25 = vadd.f32 %v230_v23, %v2673_v19  ;;  %v232_v26 = vpop.f32.mrb[3].mxu0  ;;  %v2329_v23 = vld [vmem:[#allocation5 + $0x84] ss:$8 sps:$4 sm:$0xff]  }
 0x118   :  { %v233_v28 = vadd.f32 %v232_v26, %v2676_v21 }
 0x119   :  { %v305_v29 = vpack.c.bf16 %v231_v25, %v227_v24 }
 0x11a   :  { %v306_v30 = vpack.c.bf16 %v233_v28, %v229_v27  ;;  %v2327_v28 = vld [vmem:[#allocation5 + $0x80] ss:$8 sps:$4 sm:$0xff]  }
 0x11c   :  { %v236_v33 = vpop.f32.mrb[4].mxu0  ;;  %759 = vmatprep.mubr.bf16.mxu1 %v306_v30  ;;  %872 = vmatprep.mubr.bf16.mxu0 %v306_v30 }
 0x11d   :  { %v238_v34 = vpop.f32.mrb[5].mxu0  ;;  %760 = vmatmul.mubr.bf16.vlgmr.msra.gmra.mrb[0].mxu1 %v305_v29  ;;  %873 = vmatmul.mubr.bf16.vlgmr.msra.gmra.mrb[32].mxu0 %v305_v29  ;;  %v237_v37 = vadd.f32 %v236_v33, %v2673_v19  ;;  %v2332_v29 = vld [vmem:[#allocation5 + $0x94] ss:$8 sps:$4 sm:$0xff]   ;;  %v2330_v33 = vld [vmem:[#allocation5 + $0x90] ss:$8 sps:$4 sm:$0xff]  }
 0x11e   :  { %v240_v35 = vpop.f32.mrb[6].mxu0  ;;  %1382 = vmatpush1.bf16.msra.mxu1 %v2303_v31  ;;  %v239_v41 = vadd.f32 %v238_v34, %v2676_v21 }
 0x11f   :  { %v241_v38 = vadd.f32 %v240_v35, %v2673_v19  ;;  %v242_v39 = vpop.f32.mrb[7].mxu0  ;;  %1383 = vmatprep.subr.bf16.mxu1 %v2308_v32 }
 0x120   :  { %v243_v42 = vadd.f32 %v242_v39, %v2676_v21 }
 0x121   :  { %v307_v43 = vpack.c.bf16 %v241_v38, %v237_v37  ;;  %v2335_v37 = vld [vmem:[#allocation5 + $0xa4] ss:$8 sps:$4 sm:$0xff]  }
 0x122   :  { %v308_v44 = vpack.c.bf16 %v243_v42, %v239_v41  ;;  %1384 = vmatpush1.bf16.msra.mxu1 %v2306_v36  ;;  %v2333_v42 = vld [vmem:[#allocation5 + $0xa0] ss:$8 sps:$4 sm:$0xff]  }
 0x123   :  { %1385 = vmatprep.subr.bf16.mxu1 %v2311_v40 }
 0x124   :  { %v246_v47 = vpop.f32.mrb[8].mxu0  ;;  %769 = vmatprep.mubr.bf16.mxu1 %v308_v44  ;;  %882 = vmatprep.mubr.bf16.mxu0 %v308_v44 }
 0x125   :  { %v248_v48 = vpop.f32.mrb[9].mxu0  ;;  %770 = vmatmul.mubr.bf16.gmra.mrb[4].mxu1 %v307_v43  ;;  %883 = vmatmul.mubr.bf16.gmra.mrb[36].mxu0 %v307_v43  ;;  %v247_v51 = vadd.f32 %v246_v47, %v2673_v19  ;;  %v2338_v43 = vld [vmem:[#allocation5 + $0xb4] ss:$8 sps:$4 sm:$0xff]   ;;  %v2336_v47 = vld [vmem:[#allocation5 + $0xb0] ss:$8 sps:$4 sm:$0xff]  }
 0x126   :  { %v250_v49 = vpop.f32.mrb[10].mxu0  ;;  %1386 = vmatpush1.bf16.msra.mxu1 %v2309_v45  ;;  %v249_v55 = vadd.f32 %v248_v48, %v2676_v21 }
 0x127   :  { %v251_v52 = vadd.f32 %v250_v49, %v2673_v19  ;;  %v252_v53 = vpop.f32.mrb[11].mxu0  ;;  %1387 = vmatprep.subr.bf16.mxu1 %v2314_v46 }
 0x128   :  { %v253_v56 = vadd.f32 %v252_v53, %v2676_v21 }
 0x129   :  { %v309_v57 = vpack.c.bf16 %v251_v52, %v247_v51  ;;  %v2341_v51 = vld [vmem:[#allocation5 + $0xc4] ss:$8 sps:$4 sm:$0xff]  }
 0x12a   :  { %v310_v58 = vpack.c.bf16 %v253_v56, %v249_v55  ;;  %1388 = vmatpush1.bf16.msra.mxu1 %v2312_v50  ;;  %v2339_v56 = vld [vmem:[#allocation5 + $0xc0] ss:$8 sps:$4 sm:$0xff]  }
 0x12b   :  { %1389 = vmatprep.subr.bf16.mxu1 %v2317_v54 }
 0x12c   :  { %v256_v61 = vpop.f32.mrb[12].mxu0  ;;  %779 = vmatprep.mubr.bf16.mxu1 %v310_v58  ;;  %892 = vmatprep.mubr.bf16.mxu0 %v310_v58 }
 0x12d   :  { %v258_v62 = vpop.f32.mrb[13].mxu0  ;;  %780 = vmatmul.mubr.bf16.gmra.mrb[8].mxu1 %v309_v57  ;;  %893 = vmatmul.mubr.bf16.gmra.mrb[40].mxu0 %v309_v57  ;;  %v257_v2 = vadd.f32 %v256_v61, %v2673_v19  ;;  %v2344_v57 = vld [vmem:[#allocation5 + $0xd4] ss:$8 sps:$4 sm:$0xff]   ;;  %v2342_v61 = vld [vmem:[#allocation5 + $0xd0] ss:$8 sps:$4 sm:$0xff]  }
 0x12e   :  { %v260_v63 = vpop.f32.mrb[14].mxu0  ;;  %1390 = vmatpush1.bf16.msra.mxu1 %v2315_v59  ;;  %v259_v0 = vadd.f32 %v258_v62, %v2676_v21 }
 0x12f   :  { %v261_v3 = vadd.f32 %v260_v63, %v2673_v19  ;;  %v262_v4 = vpop.f32.mrb[15].mxu0  ;;  %1391 = vmatprep.subr.bf16.mxu1 %v2320_v60 }
 0x130   :  { %v263_v6 = vadd.f32 %v262_v4, %v2676_v21 }
 0x131   :  { %v311_v7 = vpack.c.bf16 %v261_v3, %v257_v2 }
 0x132   :  { %v312_v8 = vpack.c.bf16 %v263_v6, %v259_v0  ;;  %1392 = vmatpush1.bf16.msra.mxu1 %v2318_v1  ;;  %v2347_v0 = vld [vmem:[#allocation5 + $0xe4] ss:$8 sps:$4 sm:$0xff]   ;;  %v2345_v6 = vld [vmem:[#allocation5 + $0xe0] ss:$8 sps:$4 sm:$0xff]  }
 0x133   :  { %1393 = vmatprep.subr.bf16.mxu1 %v2323_v5 }
 0x134   :  { %v266_v11 = vpop.f32.mrb[16].mxu0  ;;  %789 = vmatprep.mubr.bf16.mxu1 %v312_v8  ;;  %902 = vmatprep.mubr.bf16.mxu0 %v312_v8  ;;  %v2348_v8 = vld [vmem:[#allocation5 + $0xf0] ss:$8 sps:$4 sm:$0xff]  }
 0x135   :  { %v268_v12 = vpop.f32.mrb[17].mxu0  ;;  %790 = vmatmul.mubr.bf16.gmra.mrb[12].mxu1 %v311_v7  ;;  %903 = vmatmul.mubr.bf16.gmra.mrb[44].mxu0 %v311_v7  ;;  %v267_v17 = vadd.f32 %v266_v11, %v2673_v19  ;;  %v2350_v7 = vld [vmem:[#allocation5 + $0xf4] ss:$8 sps:$4 sm:$0xff]  }
 0x136   :  { %v270_v13 = vpop.f32.mrb[18].mxu0  ;;  %1394 = vmatpush1.bf16.msra.mxu1 %v2321_v9  ;;  %v269_v24 = vadd.f32 %v268_v12, %v2676_v21  ;;  %v397_v9 = vsub.s32 2, %v2661_v15 }
 0x137   :  { %v271_v20 = vadd.f32 %v270_v13, %v2673_v19  ;;  %v272_v22 = vpop.f32.mrb[19].mxu0  ;;  %1395 = vmatprep.subr.bf16.mxu1 %v2326_v10  ;;  %v401_v10 = vsub.s32 3, %v2661_v15 }
 0x138   :  { %v273_v25 = vadd.f32 %v272_v22, %v2676_v21 }
 0x139   :  { %v313_v26 = vpack.c.bf16 %v271_v20, %v267_v17 }
 0x13a   :  { %v314_v27 = vpack.c.bf16 %v273_v25, %v269_v24  ;;  %1396 = vmatpush1.bf16.msra.mxu1 %v2324_v14  ;;  %v2399_v24 = vld [vmem:[#allocation7 + $0x40] sm:$0xff]  }
 0x13b   :  { %1397 = vmatprep.subr.bf16.mxu1 %v2329_v23  ;;  %v2400_v25 = vld [vmem:[#allocation7] sm:$0xff]   ;;  %2054 = vmatprep.subr.bf16.mxu0 %v2399_v24 }
 0x13c   :  { %v276_v30 = vpop.f32.mrb[20].mxu0  ;;  %799 = vmatprep.mubr.bf16.mxu1 %v314_v27  ;;  %912 = vmatprep.mubr.bf16.mxu0 %v314_v27 }
 0x13d   :  { %v278_v31 = vpop.f32.mrb[21].mxu0  ;;  %800 = vmatmul.mubr.bf16.gmra.mrb[16].mxu1 %v313_v26  ;;  %913 = vmatmul.mubr.bf16.gmra.mrb[48].mxu0 %v313_v26  ;;  %v277_v34 = vadd.f32 %v276_v30, %v2673_v19  ;;  %v2401_v26 = vld [vmem:[#allocation7 + $0x48] sm:$0xff]  }
 0x13e   :  { %v280_v32 = vpop.f32.mrb[22].mxu0  ;;  %1398 = vmatpush1.bf16.msra.mxu1 %v2327_v28  ;;  %v279_v38 = vadd.f32 %v278_v31, %v2676_v21  ;;  %2055 = vmatpush3.bf16.msra.mxu0 %v2400_v25  ;;  %v2360_v25 = vld [vmem:[#allocation5 + $0x130] ss:$8 sps:$4 sm:$0xff]  }
 0x13f   :  { %v281_v35 = vadd.f32 %v280_v32, %v2673_v19  ;;  %v282_v36 = vpop.f32.mrb[23].mxu0  ;;  %1399 = vmatprep.subr.bf16.mxu1 %v2332_v29  ;;  %2056 = vmatprep.subr.bf16.mxu0 %v2401_v26 }
 0x140   :  { %v283_v39 = vadd.f32 %v282_v36, %v2676_v21 }
 0x141   :  { %v315_v40 = vpack.c.bf16 %v281_v35, %v277_v34 }
 0x142   :  { %v316_v41 = vpack.c.bf16 %v283_v39, %v279_v38  ;;  %1400 = vmatpush1.bf16.msra.mxu1 %v2330_v33  ;;  %v2402_v38 = vld [vmem:[#allocation7 + $0x8] sm:$0xff]  }
 0x143   :  { %1401 = vmatprep.subr.bf16.mxu1 %v2335_v37  ;;  %2057 = vmatpush3.bf16.msra.mxu0 %v2402_v38 }
 0x144   :  { %v286_v44 = vpop.f32.mrb[24].mxu0  ;;  %809 = vmatprep.mubr.bf16.mxu1 %v316_v41  ;;  %922 = vmatprep.mubr.bf16.mxu0 %v316_v41  ;;  %v2403_v41 = vld [vmem:[#allocation7 + $0x50] sm:$0xff]  }
 0x145   :  { %v288_v45 = vpop.f32.mrb[25].mxu0  ;;  %810 = vmatmul.mubr.bf16.gmra.mrb[20].mxu1 %v315_v40  ;;  %923 = vmatmul.mubr.bf16.gmra.mrb[52].mxu0 %v315_v40  ;;  %v287_v48 = vadd.f32 %v286_v44, %v2673_v19  ;;  %v2351_v44 = vld [vmem:[#allocation5 + $0x100] ss:$8 sps:$4 sm:$0xff]  }
 0x146   :  { %v290_v46 = vpop.f32.mrb[26].mxu0  ;;  %1402 = vmatpush1.bf16.msra.mxu1 %v2333_v42  ;;  %v289_v52 = vadd.f32 %v288_v45, %v2676_v21  ;;  %v2356_v45 = vld [vmem:[#allocation5 + $0x114] ss:$8 sps:$4 sm:$0xff]   ;;  %2058 = vmatprep.subr.bf16.mxu0 %v2403_v41  ;;  %v2410_v41 = vld [vmem:[#allocation7 + $0x28] sm:$0xff]  }
 0x147   :  { %v291_v49 = vadd.f32 %v290_v46, %v2673_v19  ;;  %v292_v50 = vpop.f32.mrb[27].mxu0  ;;  %1403 = vmatprep.subr.bf16.mxu1 %v2338_v43 }
 0x148   :  { %v293_v53 = vadd.f32 %v292_v50, %v2676_v21 }
 0x149   :  { %v317_v54 = vpack.c.bf16 %v291_v49, %v287_v48  ;;  %v2404_v48 = vld [vmem:[#allocation7 + $0x10] sm:$0xff]  }
 0x14a   :  { %v318_v55 = vpack.c.bf16 %v293_v53, %v289_v52  ;;  %1404 = vmatpush1.bf16.msra.mxu1 %v2336_v47  ;;  %2059 = vmatpush3.bf16.msra.mxu0 %v2404_v48  ;;  %v2363_v48 = vld [vmem:[#allocation5 + $0x140] ss:$8 sps:$4 sm:$0xff]  }
 0x14b   :  { %1405 = vmatprep.subr.bf16.mxu1 %v2341_v51  ;;  %v2405_v51 = vld [vmem:[#allocation7 + $0x58] sm:$0xff]  }
 0x14c   :  { %v296_v58 = vpop.f32.mrb[28].mxu0  ;;  %819 = vmatprep.mubr.bf16.mxu1 %v318_v55  ;;  %932 = vmatprep.mubr.bf16.mxu0 %v318_v55 }
 0x14d   :  { %v298_v59 = vpop.f32.mrb[29].mxu0  ;;  %820 = vmatmul.mubr.bf16.gmra.mrb[24].mxu1 %v317_v54  ;;  %933 = vmatmul.mubr.bf16.gmra.mrb[56].mxu0 %v317_v54  ;;  %v297_v62 = vadd.f32 %v296_v58, %v2673_v19  ;;  %v2354_v54 = vld [vmem:[#allocation5 + $0x110] ss:$8 sps:$4 sm:$0xff]  }
 0x14e   :  { %v300_v60 = vpop.f32.mrb[30].mxu0  ;;  %1406 = vmatpush1.bf16.msra.mxu1 %v2339_v56  ;;  %v299_v2 = vadd.f32 %v298_v59, %v2676_v21  ;;  %2060 = vmatprep.subr.bf16.mxu0 %v2405_v51 }
 0x14f   :  { %v301_v63 = vadd.f32 %v300_v60, %v2673_v19  ;;  %v302_v1 = vpop.f32.mrb[31].mxu0  ;;  %1407 = vmatprep.subr.bf16.mxu1 %v2344_v57  ;;  %v2353_v19 = vld [vmem:[#allocation5 + $0x104] ss:$8 sps:$4 sm:$0xff]  }
 0x150   :  { %v303_v3 = vadd.f32 %v302_v1, %v2676_v21  ;;  %v385_v21 = vld [vmem:[%s2984_s4] sm:$0xf] }
 0x151   :  { %v319_v4 = vpack.c.bf16 %v301_v63, %v297_v62  ;;  %v2716_v11 = vrot.slane %v385_v21, %v2664_v16  ;;  %v2718_v12 = vrot.slane %v385_v21, %v397_v9  ;;  %v2721_v17 = vrot.slane %v385_v21, %v2670_v18 }
 0x152   :  { %v320_v5 = vpack.c.bf16 %v303_v3, %v299_v2  ;;  %1408 = vmatpush1.bf16.msra.mxu1 %v2342_v61  ;;  %v2723_v20 = vrot.slane %v385_v21, %v401_v10  ;;  %v2359_v61 = vld [vmem:[#allocation5 + $0x124] ss:$8 sps:$4 sm:$0xff]   ;;  %v2406_v3 = vld [vmem:[#allocation7 + $0x18] sm:$0xff]  }
 0x153   :  { %1409 = vmatprep.subr.bf16.mxu1 %v2347_v0  ;;  %v2407_v0 = vld [vmem:[#allocation7 + $0x60] sm:$0xff]   ;;  %2061 = vmatpush3.bf16.msra.mxu0 %v2406_v3 }
 0x154   :  { %829 = vmatprep.mubr.bf16.mxu1 %v320_v5  ;;  %942 = vmatprep.mubr.bf16.mxu0 %v320_v5  ;;  %v2408_v10 = vld [vmem:[#allocation7 + $0x20] sm:$0xff]  }
 0x155   :  { %830 = vmatmul.mubr.bf16.gmra.mrb[28].mxu1 %v319_v4  ;;  %943 = vmatmul.mubr.bf16.gmra.mrb[60].mxu0 %v319_v4 }
 0x156   :  { %1410 = vmatpush1.bf16.msra.mxu1 %v2345_v6  ;;  %2062 = vmatprep.subr.bf16.mxu0 %v2407_v0  ;;  %v2371_v0 = vld [vmem:[#allocation5 + $0x164] ss:$8 sps:$4 sm:$0xff]  }
 0x157   :  { %1411 = vmatprep.subr.bf16.mxu1 %v2350_v7  ;;  %2063 = vmatpush3.bf16.msra.mxu0 %v2408_v10 }
 0x15a   :  { %1412 = vmatpush1.bf16.msra.mxu1 %v2348_v8  ;;  %v2357_v8 = vld [vmem:[#allocation5 + $0x120] ss:$8 sps:$4 sm:$0xff]  }
 0x15b   :  { %1494 = vmatprep.subr.bf16.mxu1 %v2353_v19  ;;  %v2362_v19 = vld [vmem:[#allocation5 + $0x134] ss:$8 sps:$4 sm:$0xff]  }
 0x1f0   :  { %v761_v13 = vpop.f32.mrb[0].mxu1  ;;  %v874_v14 = vpop.f32.mrb[32].mxu0 }
 0x1f1   :  { %v763_v22 = vpop.f32.mrb[1].mxu1  ;;  %v876_v23 = vpop.f32.mrb[33].mxu0  ;;  %v762_v15 = vadd.f32 %v761_v13, %v2716_v11  ;;  %v2727_v29 = vadd.f32 %v874_v14, %v2718_v12 }
 0x1f2   :  { %v765_v27 = vpop.f32.mrb[2].mxu1  ;;  %v878_v28 = vpop.f32.mrb[34].mxu0  ;;  %v764_v34 = vadd.f32 %v763_v22, %v2721_v17  ;;  %v2735_v35 = vadd.f32 %v876_v23, %v2723_v20  ;;  %v2409_v22 = vld [vmem:[#allocation7 + $0x68] sm:$0xff]  }
 0x1f3   :  { %v766_v30 = vadd.f32 %v765_v27, %v2716_v11  ;;  %v2731_v31 = vadd.f32 %v878_v28, %v2718_v12  ;;  %v767_v32 = vpop.f32.mrb[3].mxu1  ;;  %v880_v33 = vpop.f32.mrb[35].mxu0  ;;  %2064 = vmatprep.subr.bf16.mxu0 %v2409_v22  ;;  %v2369_v22 = vld [vmem:[#allocation5 + $0x160] ss:$8 sps:$4 sm:$0xff]  }
 0x1f4   :  { %v768_v36 = vadd.f32 %v767_v32, %v2721_v17  ;;  %v2739_v37 = vadd.f32 %v880_v33, %v2723_v20  ;;  %v2365_v33 = vld [vmem:[#allocation5 + $0x144] ss:$8 sps:$4 sm:$0xff]   ;;  %2065 = vmatpush3.bf16.msra.mxu0 %v2410_v41 }
 0x1f5   :  { %v953_v39 = vpack.c.bf16 %v766_v30, %v762_v15  ;;  %v955_v40 = vpack.c.bf16 %v2731_v31, %v2727_v29  ;;  %v2414_v29 = vld [vmem:[#allocation7 + $0x38] sm:$0xff]   ;;  %v1049_v31 = vld [vmem:[%s2986_s6] sm:$0x3] }
 0x1f6   :  { %v954_v42 = vpack.c.bf16 %v768_v36, %v764_v34  ;;  %v956_v43 = vpack.c.bf16 %v2739_v37, %v2735_v35  ;;  %v2907_v35 = vrot.slane %v1049_v31, %v2664_v16 }
 0x1f8   :  { %v771_v46 = vpop.f32.mrb[4].mxu1  ;;  %v884_v47 = vpop.f32.mrb[36].mxu0  ;;  %1413 = vmatprep.mubr.bf16.mxu1 %v954_v42 }
 0x1f9   :  { %v773_v49 = vpop.f32.mrb[5].mxu1  ;;  %v886_v50 = vpop.f32.mrb[37].mxu0  ;;  %1414 = vmatmul.mubr.bf16.vlgmr.msra.gmra.mrb[32].mxu1 %v953_v39  ;;  %v772_v55 = vadd.f32 %v771_v46, %v2716_v11  ;;  %v2747_v56 = vadd.f32 %v884_v47, %v2718_v12 }
 0x1fa   :  { %1495 = vmatpush1.bf16.msra.mxu1 %v2351_v44  ;;  %v775_v52 = vpop.f32.mrb[6].mxu1  ;;  %v888_v53 = vpop.f32.mrb[38].mxu0  ;;  %v774_v62 = vadd.f32 %v773_v49, %v2721_v17  ;;  %v2755_v63 = vadd.f32 %v886_v50, %v2723_v20  ;;  %v2368_v49 = vld [vmem:[#allocation5 + $0x154] ss:$8 sps:$4 sm:$0xff]  }
 0x1fb   :  { %v776_v57 = vadd.f32 %v775_v52, %v2716_v11  ;;  %v2751_v58 = vadd.f32 %v888_v53, %v2718_v12  ;;  %v777_v59 = vpop.f32.mrb[7].mxu1  ;;  %v890_v60 = vpop.f32.mrb[39].mxu0  ;;  %1496 = vmatprep.subr.bf16.mxu1 %v2356_v45  ;;  %v2411_v45 = vld [vmem:[#allocation7 + $0x70] sm:$0xff]  }
 0x1fc   :  { %v778_v1 = vadd.f32 %v777_v59, %v2721_v17  ;;  %v2759_v2 = vadd.f32 %v890_v60, %v2723_v20  ;;  %v2412_v52 = vld [vmem:[#allocation7 + $0x30] sm:$0xff]   ;;  %2066 = vmatprep.subr.bf16.mxu0 %v2411_v45 }
 0x1fd   :  { %v957_v4 = vpack.c.bf16 %v776_v57, %v772_v55  ;;  %v959_v5 = vpack.c.bf16 %v2751_v58, %v2747_v56  ;;  %v2366_v59 = vld [vmem:[#allocation5 + $0x150] ss:$8 sps:$4 sm:$0xff]   ;;  %2067 = vmatpush3.bf16.msra.mxu0 %v2412_v52 }
 0x1fe   :  { %v958_v6 = vpack.c.bf16 %v778_v1, %v774_v62  ;;  %v960_v7 = vpack.c.bf16 %v2759_v2, %v2755_v63  ;;  %1497 = vmatpush1.bf16.msra.mxu1 %v2354_v54 }
 0x1ff   :  { %1498 = vmatprep.subr.bf16.mxu1 %v2359_v61 }
 0x200   :  { %v781_v9 = vpop.f32.mrb[8].mxu1  ;;  %v894_v21 = vpop.f32.mrb[40].mxu0  ;;  %1423 = vmatprep.mubr.bf16.mxu1 %v958_v6 }
 0x201   :  { %v783_v13 = vpop.f32.mrb[9].mxu1  ;;  %v896_v14 = vpop.f32.mrb[41].mxu0  ;;  %1424 = vmatmul.mubr.bf16.gmra.mrb[36].mxu1 %v957_v4  ;;  %v782_v26 = vadd.f32 %v781_v9, %v2716_v11  ;;  %v2767_v27 = vadd.f32 %v894_v21, %v2718_v12 }
 0x202   :  { %1499 = vmatpush1.bf16.msra.mxu1 %v2357_v8  ;;  %v785_v23 = vpop.f32.mrb[10].mxu1  ;;  %v898_v24 = vpop.f32.mrb[42].mxu0  ;;  %v784_v34 = vadd.f32 %v783_v13, %v2721_v17  ;;  %v2775_v36 = vadd.f32 %v896_v14, %v2723_v20 }
 0x203   :  { %v786_v28 = vadd.f32 %v785_v23, %v2716_v11  ;;  %v2771_v15 = vadd.f32 %v898_v24, %v2718_v12  ;;  %v787_v30 = vpop.f32.mrb[11].mxu1  ;;  %v900_v32 = vpop.f32.mrb[43].mxu0  ;;  %1500 = vmatprep.subr.bf16.mxu1 %v2362_v19  ;;  %v2374_v23 = vld [vmem:[#allocation5 + $0x174] ss:$8 sps:$4 sm:$0xff]  }
 0x204   :  { %v788_v38 = vadd.f32 %v787_v30, %v2721_v17  ;;  %v2779_v39 = vadd.f32 %v900_v32, %v2723_v20 }
 0x205   :  { %v961_v42 = vpack.c.bf16 %v786_v28, %v782_v26  ;;  %v963_v44 = vpack.c.bf16 %v2771_v15, %v2767_v27 }
 0x206   :  { %v962_v46 = vpack.c.bf16 %v788_v38, %v784_v34  ;;  %v964_v47 = vpack.c.bf16 %v2779_v39, %v2775_v36  ;;  %1501 = vmatpush1.bf16.msra.mxu1 %v2360_v25 }
 0x207   :  { %1502 = vmatprep.subr.bf16.mxu1 %v2365_v33  ;;  %v2372_v33 = vld [vmem:[#allocation5 + $0x170] ss:$8 sps:$4 sm:$0xff]  }
 0x208   :  { %v791_v50 = vpop.f32.mrb[12].mxu1  ;;  %v904_v51 = vpop.f32.mrb[44].mxu0  ;;  %1433 = vmatprep.mubr.bf16.mxu1 %v962_v46 }
 0x209   :  { %v793_v53 = vpop.f32.mrb[13].mxu1  ;;  %v906_v54 = vpop.f32.mrb[45].mxu0  ;;  %1434 = vmatmul.mubr.bf16.gmra.mrb[40].mxu1 %v961_v42  ;;  %v792_v60 = vadd.f32 %v791_v50, %v2716_v11  ;;  %v2787_v61 = vadd.f32 %v904_v51, %v2718_v12 }
 0x20a   :  { %1503 = vmatpush1.bf16.msra.mxu1 %v2363_v48  ;;  %v795_v55 = vpop.f32.mrb[14].mxu1  ;;  %v908_v57 = vpop.f32.mrb[46].mxu0  ;;  %v794_v6 = vadd.f32 %v793_v53, %v2721_v17  ;;  %v2795_v8 = vadd.f32 %v906_v54, %v2723_v20  ;;  %v2377_v48 = vld [vmem:[#allocation5 + $0x184] ss:$8 sps:$4 sm:$0xff]  }
 0x20b   :  { %v796_v62 = vadd.f32 %v795_v55, %v2716_v11  ;;  %v2791_v1 = vadd.f32 %v908_v57, %v2718_v12  ;;  %v797_v3 = vpop.f32.mrb[15].mxu1  ;;  %v910_v4 = vpop.f32.mrb[47].mxu0  ;;  %1504 = vmatprep.subr.bf16.mxu1 %v2368_v49 }
 0x20c   :  { %v798_v19 = vadd.f32 %v797_v3, %v2721_v17  ;;  %v2799_v9 = vadd.f32 %v910_v4, %v2723_v20 }
 0x20d   :  { %v965_v21 = vpack.c.bf16 %v796_v62, %v792_v60  ;;  %v967_v10 = vpack.c.bf16 %v2791_v1, %v2787_v61  ;;  %v2380_v60 = vld [vmem:[#allocation5 + $0x194] ss:$8 sps:$4 sm:$0xff]  }
 0x20e   :  { %v966_v13 = vpack.c.bf16 %v798_v19, %v794_v6  ;;  %v968_v14 = vpack.c.bf16 %v2799_v9, %v2795_v8  ;;  %1505 = vmatpush1.bf16.msra.mxu1 %v2366_v59  ;;  %v2375_v59 = vld [vmem:[#allocation5 + $0x180] ss:$8 sps:$4 sm:$0xff]  }
 0x20f   :  { %1506 = vmatprep.subr.bf16.mxu1 %v2371_v0 }
 0x210   :  { %v801_v24 = vpop.f32.mrb[16].mxu1  ;;  %v914_v25 = vpop.f32.mrb[48].mxu0  ;;  %1443 = vmatprep.mubr.bf16.mxu1 %v966_v13 }
 0x211   :  { %v803_v26 = vpop.f32.mrb[17].mxu1  ;;  %v916_v28 = vpop.f32.mrb[49].mxu0  ;;  %1444 = vmatmul.mubr.bf16.gmra.mrb[44].mxu1 %v965_v21  ;;  %v802_v34 = vadd.f32 %v801_v24, %v2716_v11  ;;  %v2807_v38 = vadd.f32 %v914_v25, %v2718_v12  ;;  %v2378_v21 = vld [vmem:[#allocation5 + $0x190] ss:$8 sps:$4 sm:$0xff]  }
 0x212   :  { %1507 = vmatpush1.bf16.msra.mxu1 %v2369_v22  ;;  %v805_v30 = vpop.f32.mrb[18].mxu1  ;;  %v918_v32 = vpop.f32.mrb[50].mxu0  ;;  %v804_v49 = vadd.f32 %v803_v26, %v2721_v17  ;;  %v2815_v50 = vadd.f32 %v916_v28, %v2723_v20  ;;  %v2383_v28 = vld [vmem:[#allocation5 + $0x1a4] ss:$8 sps:$4 sm:$0xff]  }
 0x213   :  { %v806_v41 = vadd.f32 %v805_v30, %v2716_v11  ;;  %v2811_v42 = vadd.f32 %v918_v32, %v2718_v12  ;;  %v807_v45 = vpop.f32.mrb[19].mxu1  ;;  %v920_v46 = vpop.f32.mrb[51].mxu0  ;;  %1508 = vmatprep.subr.bf16.mxu1 %v2374_v23 }
 0x214   :  { %v808_v51 = vadd.f32 %v807_v45, %v2721_v17  ;;  %v2819_v52 = vadd.f32 %v920_v46, %v2723_v20 }
 0x215   :  { %v969_v53 = vpack.c.bf16 %v806_v41, %v802_v34  ;;  %v971_v54 = vpack.c.bf16 %v2811_v42, %v2807_v38 }
 0x216   :  { %v970_v55 = vpack.c.bf16 %v808_v51, %v804_v49  ;;  %v972_v57 = vpack.c.bf16 %v2819_v52, %v2815_v50  ;;  %1509 = vmatpush1.bf16.msra.mxu1 %v2372_v33  ;;  %v2381_v49 = vld [vmem:[#allocation5 + $0x1a0] ss:$8 sps:$4 sm:$0xff]   ;;  %v2386_v51 = vld [vmem:[#allocation5 + $0x1b4] ss:$8 sps:$4 sm:$0xff]  }
 0x217   :  { %1510 = vmatprep.subr.bf16.mxu1 %v2377_v48 }
 0x218   :  { %v811_v62 = vpop.f32.mrb[20].mxu1  ;;  %v924_v3 = vpop.f32.mrb[52].mxu0  ;;  %1453 = vmatprep.mubr.bf16.mxu1 %v970_v55 }
 0x219   :  { %v813_v4 = vpop.f32.mrb[21].mxu1  ;;  %v926_v0 = vpop.f32.mrb[53].mxu0  ;;  %1454 = vmatmul.mubr.bf16.gmra.mrb[48].mxu1 %v969_v53  ;;  %v812_v13 = vadd.f32 %v811_v62, %v2716_v11  ;;  %v2827_v22 = vadd.f32 %v924_v3, %v2718_v12 }
 0x21a   :  { %1511 = vmatpush1.bf16.msra.mxu1 %v2375_v59  ;;  %v815_v6 = vpop.f32.mrb[22].mxu1  ;;  %v928_v19 = vpop.f32.mrb[54].mxu0  ;;  %v814_v30 = vadd.f32 %v813_v4, %v2721_v17  ;;  %v2835_v32 = vadd.f32 %v926_v0, %v2723_v20  ;;  %v2384_v4 = vld [vmem:[#allocation5 + $0x1b0] ss:$8 sps:$4 sm:$0xff]  }
 0x21b   :  { %v816_v23 = vadd.f32 %v815_v6, %v2716_v11  ;;  %v2831_v24 = vadd.f32 %v928_v19, %v2718_v12  ;;  %v817_v25 = vpop.f32.mrb[23].mxu1  ;;  %v930_v26 = vpop.f32.mrb[55].mxu0  ;;  %1512 = vmatprep.subr.bf16.mxu1 %v2380_v60 }
 0x21c   :  { %v818_v33 = vadd.f32 %v817_v25, %v2721_v17  ;;  %v2839_v34 = vadd.f32 %v930_v26, %v2723_v20  ;;  %v2389_v25 = vld [vmem:[#allocation5 + $0x1c4] ss:$8 sps:$4 sm:$0xff]  }
 0x21d   :  { %v973_v41 = vpack.c.bf16 %v816_v23, %v812_v13 }
 0x21e   :  { %v974_v46 = vpack.c.bf16 %v818_v33, %v814_v30  ;;  %v976_v48 = vpack.c.bf16 %v2839_v34, %v2835_v32  ;;  %1513 = vmatpush1.bf16.msra.mxu1 %v2378_v21 }
 0x21f   :  { %1514 = vmatprep.subr.bf16.mxu1 %v2383_v28 }
 0x220   :  { %v821_v53 = vpop.f32.mrb[24].mxu1  ;;  %v934_v55 = vpop.f32.mrb[56].mxu0  ;;  %1463 = vmatprep.mubr.bf16.mxu1 %v974_v46 }
 0x221   :  { %v823_v59 = vpop.f32.mrb[25].mxu1  ;;  %v936_v60 = vpop.f32.mrb[57].mxu0  ;;  %1464 = vmatmul.mubr.bf16.gmra.mrb[52].mxu1 %v973_v41  ;;  %v822_v0 = vadd.f32 %v821_v53, %v2716_v11  ;;  %v2847_v6 = vadd.f32 %v934_v55, %v2718_v12  ;;  %v2387_v55 = vld [vmem:[#allocation5 + $0x1c0] ss:$8 sps:$4 sm:$0xff]  }
 0x222   :  { %1515 = vmatpush1.bf16.msra.mxu1 %v2381_v49  ;;  %v825_v62 = vpop.f32.mrb[26].mxu1  ;;  %v938_v3 = vpop.f32.mrb[58].mxu0  ;;  %v824_v26 = vadd.f32 %v823_v59, %v2721_v17  ;;  %v937_v28 = vadd.f32 %v936_v60, %v2723_v20 }
 0x223   :  { %v826_v19 = vadd.f32 %v825_v62, %v2716_v11  ;;  %v2851_v21 = vadd.f32 %v938_v3, %v2718_v12  ;;  %v827_v13 = vpop.f32.mrb[27].mxu1  ;;  %v940_v23 = vpop.f32.mrb[59].mxu0  ;;  %1516 = vmatprep.subr.bf16.mxu1 %v2386_v51  ;;  %v2392_v62 = vld [vmem:[#allocation5 + $0x1d4] ss:$8 sps:$4 sm:$0xff]  }
 0x224   :  { %v828_v30 = vadd.f32 %v827_v13, %v2721_v17  ;;  %v941_v33 = vadd.f32 %v940_v23, %v2723_v20  ;;  %v2390_v23 = vld [vmem:[#allocation5 + $0x1d0] ss:$8 sps:$4 sm:$0xff]  }
 0x225   :  { %v977_v41 = vpack.c.bf16 %v826_v19, %v822_v0  ;;  %v979_v46 = vpack.c.bf16 %v2851_v21, %v2847_v6 }
 0x226   :  { %v978_v49 = vpack.c.bf16 %v828_v30, %v824_v26  ;;  %v980_v53 = vpack.c.bf16 %v941_v33, %v937_v28  ;;  %1517 = vmatpush1.bf16.msra.mxu1 %v2384_v4  ;;  %v2395_v26 = vld [vmem:[#allocation5 + $0x1e4] ss:$8 sps:$4 sm:$0xff]  }
 0x227   :  { %1518 = vmatprep.subr.bf16.mxu1 %v2389_v25 }
 0x228   :  { %v831_v51 = vpop.f32.mrb[28].mxu1  ;;  %v944_v3 = vpop.f32.mrb[60].mxu0  ;;  %1473 = vmatprep.mubr.bf16.mxu1 %v978_v49 }
 0x229   :  { %v833_v59 = vpop.f32.mrb[29].mxu1  ;;  %v946_v45 = vpop.f32.mrb[61].mxu0  ;;  %1474 = vmatmul.mubr.bf16.gmra.mrb[56].mxu1 %v977_v41  ;;  %v832_v0 = vadd.f32 %v831_v51, %v2716_v11  ;;  %v945_v6 = vadd.f32 %v944_v3, %v2718_v12 }
 0x22a   :  { %1519 = vmatpush1.bf16.msra.mxu1 %v2387_v55  ;;  %v835_v60 = vpop.f32.mrb[30].mxu1  ;;  %v948_v13 = vpop.f32.mrb[62].mxu0  ;;  %v834_v28 = vadd.f32 %v833_v59, %v2721_v17  ;;  %v947_v30 = vadd.f32 %v946_v45, %v2723_v20  ;;  %v2396_v45 = vld [vmem:[#allocation5 + $0x1f0] ss:$8 sps:$4 sm:$0xff]  }
 0x22b   :  { %v836_v19 = vadd.f32 %v835_v60, %v2716_v11  ;;  %v949_v4 = vadd.f32 %v948_v13, %v2718_v12  ;;  %v837_v21 = vpop.f32.mrb[31].mxu1  ;;  %v950_v25 = vpop.f32.mrb[63].mxu0  ;;  %1520 = vmatprep.subr.bf16.mxu1 %v2392_v62  ;;  %v2393_v11 = vld [vmem:[#allocation5 + $0x1e0] ss:$8 sps:$4 sm:$0xff]   ;;  %v2398_v12 = vld [vmem:[#allocation5 + $0x1f4] ss:$8 sps:$4 sm:$0xff]  }
 0x22c   :  { %v838_v33 = vadd.f32 %v837_v21, %v2721_v17  ;;  %v951_v41 = vadd.f32 %v950_v25, %v2723_v20  ;;  %v2990_v17 = vpack.c.bf16 %v2831_v24, %v2827_v22  ;;  %v2413_v20 = vld [vmem:[#allocation7 + $0x78] sm:$0xff]  }
 0x22d   :  { %v981_v49 = vpack.c.bf16 %v836_v19, %v832_v0  ;;  %v983_v55 = vpack.c.bf16 %v949_v4, %v945_v6  ;;  %2068 = vmatprep.subr.bf16.mxu0 %v2413_v20 }
 0x22e   :  { %v982_v51 = vpack.c.bf16 %v838_v33, %v834_v28  ;;  %v984_v3 = vpack.c.bf16 %v951_v41, %v947_v30  ;;  %1521 = vmatpush1.bf16.msra.mxu1 %v2390_v23  ;;  %2069 = vmatpush3.bf16.msra.mxu0 %v2414_v29 }
 0x22f   :  { %1522 = vmatprep.subr.bf16.mxu1 %v2395_v26 }
 0x230   :  { %1483 = vmatprep.mubr.bf16.mxu1 %v982_v51 }
 0x231   :  { %1484 = vmatmul.mubr.bf16.gmra.mrb[60].mxu1 %v981_v49 }
 0x232   :  { %1523 = vmatpush1.bf16.msra.mxu1 %v2393_v11  ;;  %1526 = vmatprep.mubr.bf16.mxu1 %v956_v43 }
 0x233   :  { %1524 = vmatprep.subr.bf16.mxu1 %v2398_v12 }
 0x236   :  { %1525 = vmatpush1.bf16.msra.mxu1 %v2396_v45 }
 0x239   :  { %1527 = vmatmul.mubr.bf16.vlgmr.msra.gmra.mrb[32].mxu1 %v955_v40  ;;  %v2910_v40 = vrot.slane %v1049_v31, %v2670_v18 }
 0x23a   :  { %1536 = vmatprep.mubr.bf16.mxu1 %v960_v7 }
 0x241   :  { %1537 = vmatmul.mubr.bf16.gmra.mrb[36].mxu1 %v959_v5 }
 0x242   :  { %1546 = vmatprep.mubr.bf16.mxu1 %v964_v47 }
 0x249   :  { %1547 = vmatmul.mubr.bf16.gmra.mrb[40].mxu1 %v963_v44 }
 0x24a   :  { %1556 = vmatprep.mubr.bf16.mxu1 %v968_v14 }
 0x251   :  { %1557 = vmatmul.mubr.bf16.gmra.mrb[44].mxu1 %v967_v10 }
 0x252   :  { %1566 = vmatprep.mubr.bf16.mxu1 %v972_v57 }
 0x259   :  { %1567 = vmatmul.mubr.bf16.gmra.mrb[48].mxu1 %v971_v54 }
 0x25a   :  { %1576 = vmatprep.mubr.bf16.mxu1 %v976_v48 }
 0x261   :  { %1577 = vmatmul.mubr.bf16.gmra.mrb[52].mxu1 %v2990_v17 }
 0x262   :  { %1586 = vmatprep.mubr.bf16.mxu1 %v980_v53 }
 0x269   :  { %1587 = vmatmul.mubr.bf16.gmra.mrb[56].mxu1 %v979_v46 }
 0x26a   :  { %1596 = vmatprep.mubr.bf16.mxu1 %v984_v3 }
 0x271   :  { %1597 = vmatmul.mubr.bf16.gmra.mrb[60].mxu1 %v983_v55 }
 0x30c   :  { %v1528_v37 = vpop.f32.mrb[32].mxu1 }
 0x30d   :  { %v1530_v43 = vpop.f32.mrb[33].mxu1  ;;  %v2118_v58 = vadd.f32 %v1528_v37, %v2907_v35 }
 0x30e   :  { %v1532_v56 = vpop.f32.mrb[34].mxu1  ;;  %v2119_v5 = vadd.f32 %v1530_v43, %v2910_v40 }
 0x30f   :  { %v2120_v63 = vadd.f32 %v1532_v56, %v2907_v35  ;;  %v1534_v2 = vpop.f32.mrb[35].mxu1 }
 0x310   :  { %v2121_v7 = vadd.f32 %v1534_v2, %v2910_v40 }
 0x311   :  { %v1607_v27 = vpack.c.bf16 %v2120_v63, %v2118_v58 }
 0x312   :  { %v1608_v15 = vpack.c.bf16 %v2121_v7, %v2119_v5 }
 0x314   :  { %v1538_v36 = vpop.f32.mrb[36].mxu1  ;;  %1790 = vmatprep.mubr.bf16.mxu0 %v1608_v15 }
 0x315   :  { %v1540_v16 = vpop.f32.mrb[37].mxu1  ;;  %1791 = vmatmul.mubr.bf16.vlgmr.msra.gmra.mrb[64].mxu0 %v1607_v27  ;;  %v2122_v18 = vadd.f32 %v1538_v36, %v2907_v35 }
 0x316   :  { %v1542_v39 = vpop.f32.mrb[38].mxu1  ;;  %v2123_v61 = vadd.f32 %v1540_v16, %v2910_v40 }
 0x317   :  { %v2124_v44 = vadd.f32 %v1542_v39, %v2907_v35  ;;  %v1544_v47 = vpop.f32.mrb[39].mxu1 }
 0x318   :  { %v2125_v1 = vadd.f32 %v1544_v47, %v2910_v40 }
 0x319   :  { %v1609_v8 = vpack.c.bf16 %v2124_v44, %v2122_v18 }
 0x31a   :  { %v1610_v9 = vpack.c.bf16 %v2125_v1, %v2123_v61 }
 0x31c   :  { %v1548_v10 = vpop.f32.mrb[40].mxu1  ;;  %1798 = vmatprep.mubr.bf16.mxu0 %v1610_v9  ;;  %v2947_v9 = vld [vmem:[%s2988_s8] ss:$0 sm:$0xff]  ;;  %s2519_s8 = smov [#allocation8]  }
 0x31d   :  { %v1550_v14 = vpop.f32.mrb[41].mxu1  ;;  %1799 = vmatmul.mubr.bf16.gmra.mrb[68].mxu0 %v1609_v8  ;;  %v2126_v42 = vadd.f32 %v1548_v10, %v2907_v35  ;;  %s1876_s13 = sshll.u32 %s2519_s8, 4  ;;  %s1877_s13 = int_to_ptr.vmem [resolvable:$true] %s1876_s13 }
 0x31e   :  { %v1552_v38 = vpop.f32.mrb[42].mxu1  ;;  %v2127_v54 = vadd.f32 %v1550_v14, %v2910_v40  ;;  %s2481_s7 = scalar_lea.vmem %s1877_s13, 2048  ;;  %p2486_p11 = scmp.lt.s32.totalorder %s1877_s13, %s1877_s13 }
 0x31f   :  { %v2128_v50 = vadd.f32 %v1552_v38, %v2907_v35  ;;  %v1554_v52 = vpop.f32.mrb[43].mxu1  ;;  %p2482_p10 = scmp.ne.s32.totalorder %s1877_s13, %s2481_s7  ;;  %p2487_p12 = scmp.lt.s32.totalorder %s2481_s7, %s2481_s7 }
 0x320   :  { %v2129_v57 = vadd.f32 %v1554_v52, %v2910_v40 }
 0x321   :  { %v1611_v22 = vpack.c.bf16 %v2128_v50, %v2126_v42  ;;  %p2488_p13 = por %p2487_p12, %p2486_p11 }
 0x322   :  { %v1612_v24 = vpack.c.bf16 %v2129_v57, %v2127_v54 }
 0x323   :  { %p2489_p0 = pnand %p2488_p13, %p2482_p10 }
 0x324   :  { %v1558_v32 = vpop.f32.mrb[44].mxu1  ;;  %1806 = vmatprep.mubr.bf16.mxu0 %v1612_v24 }
 0x325   :  { %v1560_v34 = vpop.f32.mrb[45].mxu1  ;;  %1807 = vmatmul.mubr.bf16.gmra.mrb[72].mxu0 %v1611_v22  ;;  %v2130_v46 = vadd.f32 %v1558_v32, %v2907_v35 }
 0x326   :  { %v1562_v48 = vpop.f32.mrb[46].mxu1  ;;  %v2131_v59 = vadd.f32 %v1560_v34, %v2910_v40 }
 0x327   :  { %v2132_v53 = vadd.f32 %v1562_v48, %v2907_v35  ;;  %v1564_v62 = vpop.f32.mrb[47].mxu1 }
 0x328   :  { %v2133_v60 = vadd.f32 %v1564_v62, %v2910_v40 }
 0x329   :  { %v1613_v13 = vpack.c.bf16 %v2132_v53, %v2130_v46 }
 0x32a   :  { %v1614_v23 = vpack.c.bf16 %v2133_v60, %v2131_v59 }
 0x32c   :  { %v1568_v0 = vpop.f32.mrb[48].mxu1  ;;  %1814 = vmatprep.mubr.bf16.mxu0 %v1614_v23 }
 0x32d   :  { %v1570_v6 = vpop.f32.mrb[49].mxu1  ;;  %1815 = vmatmul.mubr.bf16.gmra.mrb[76].mxu0 %v1613_v13  ;;  %v2134_v4 = vadd.f32 %v1568_v0, %v2907_v35 }
 0x32e   :  { %v1572_v19 = vpop.f32.mrb[50].mxu1  ;;  %v2135_v26 = vadd.f32 %v1570_v6, %v2910_v40 }
 0x32f   :  { %v2136_v21 = vadd.f32 %v1572_v19, %v2907_v35  ;;  %v1574_v25 = vpop.f32.mrb[51].mxu1 }
 0x330   :  { %v2137_v28 = vadd.f32 %v1574_v25, %v2910_v40 }
 0x331   :  { %v1615_v30 = vpack.c.bf16 %v2136_v21, %v2134_v4 }
 0x332   :  { %v1616_v33 = vpack.c.bf16 %v2137_v28, %v2135_v26 }
 0x334   :  { %v1578_v41 = vpop.f32.mrb[52].mxu1  ;;  %1822 = vmatprep.mubr.bf16.mxu0 %v1616_v33 }
 0x335   :  { %v1580_v49 = vpop.f32.mrb[53].mxu1  ;;  %1823 = vmatmul.mubr.bf16.gmra.mrb[80].mxu0 %v1615_v30  ;;  %v2138_v51 = vadd.f32 %v1578_v41, %v2907_v35 }
 0x336   :  { %v1582_v55 = vpop.f32.mrb[54].mxu1  ;;  %v2139_v12 = vadd.f32 %v1580_v49, %v2910_v40 }
 0x337   :  { %v2140_v3 = vadd.f32 %v1582_v55, %v2907_v35  ;;  %v1584_v11 = vpop.f32.mrb[55].mxu1 }
 0x338   :  { %v2141_v45 = vadd.f32 %v1584_v11, %v2910_v40 }
 0x339   :  { %v1617_v17 = vpack.c.bf16 %v2140_v3, %v2138_v51 }
 0x33a   :  { %v1618_v20 = vpack.c.bf16 %v2141_v45, %v2139_v12 }
 0x33c   :  { %v1588_v29 = vpop.f32.mrb[56].mxu1  ;;  %1830 = vmatprep.mubr.bf16.mxu0 %v1618_v20 }
 0x33d   :  { %v1590_v31 = vpop.f32.mrb[57].mxu1  ;;  %1831 = vmatmul.mubr.bf16.gmra.mrb[84].mxu0 %v1617_v17  ;;  %v2142_v43 = vadd.f32 %v1588_v29, %v2907_v35 }
 0x33e   :  { %v1592_v37 = vpop.f32.mrb[58].mxu1  ;;  %v2143_v63 = vadd.f32 %v1590_v31, %v2910_v40 }
 0x33f   :  { %v2144_v56 = vadd.f32 %v1592_v37, %v2907_v35  ;;  %v1594_v58 = vpop.f32.mrb[59].mxu1 }
 0x340   :  { %v2145_v2 = vadd.f32 %v1594_v58, %v2910_v40 }
 0x341   :  { %v1619_v5 = vpack.c.bf16 %v2144_v56, %v2142_v43 }
 0x342   :  { %v1620_v7 = vpack.c.bf16 %v2145_v2, %v2143_v63 }
 0x344   :  { %v1598_v27 = vpop.f32.mrb[60].mxu1  ;;  %1838 = vmatprep.mubr.bf16.mxu0 %v1620_v7 }
 0x345   :  { %v1600_v15 = vpop.f32.mrb[61].mxu1  ;;  %1839 = vmatmul.mubr.bf16.gmra.mrb[88].mxu0 %v1619_v5  ;;  %v2146_v16 = vadd.f32 %v1598_v27, %v2907_v35 }
 0x346   :  { %v1602_v36 = vpop.f32.mrb[62].mxu1  ;;  %v2147_v44 = vadd.f32 %v1600_v15, %v2910_v40 }
 0x347   :  { %v2148_v39 = vadd.f32 %v1602_v36, %v2907_v35  ;;  %v1604_v18 = vpop.f32.mrb[63].mxu1 }
 0x348   :  { %v2149_v47 = vadd.f32 %v1604_v18, %v2910_v40 }
 0x349   :  { %v1621_v61 = vpack.c.bf16 %v2148_v39, %v2146_v16 }
 0x34a   :  { %v1622_v1 = vpack.c.bf16 %v2149_v47, %v2147_v44 }
 0x34c   :  { %1846 = vmatprep.mubr.bf16.mxu0 %v1622_v1 }
 0x34d   :  { %1847 = vmatmul.mubr.bf16.gmra.mrb[92].mxu0 %v1621_v61 }
 0x3e8   :  { %v2070_v8 = vpop.f32.mrb[64].mxu0 }
 0x3e9   :  { %v2071_v10 = vpop.f32.mrb[65].mxu0 }
 0x3ea   :  { %v2072_v14 = vadd.f32 %v2071_v10, %v2070_v8  ;;  %v2073_v38 = vpop.f32.mrb[66].mxu0 }
 0x3eb   :  { %v2074_v42 = vpop.f32.mrb[67].mxu0 }
 0x3ec   :  { %v1793_v35 = vadd.f32 %v2072_v14, %v2947_v9  ;;  %v2075_v50 = vadd.f32 %v2074_v42, %v2073_v38 }
 0x3ee   :  { %1855 = vst [vmem:[#allocation8] sm:$0xff] %v1793_v35  ;;  %v1796_v40 = vadd.f32 %v2075_v50, %v2947_v9 }
 0x3f0   :  { %1856 = vst [vmem:[#allocation8 + $0x8] sm:$0xff] %v1796_v40  ;;  %v2076_v52 = vpop.f32.mrb[68].mxu0 }
 0x3f1   :  { %v2077_v54 = vpop.f32.mrb[69].mxu0 }
 0x3f2   :  { %v2078_v57 = vadd.f32 %v2077_v54, %v2076_v52  ;;  %v2079_v22 = vpop.f32.mrb[70].mxu0 }
 0x3f3   :  { %v2080_v24 = vpop.f32.mrb[71].mxu0 }
 0x3f4   :  { %v1801_v32 = vadd.f32 %v2078_v57, %v2947_v9  ;;  %v2081_v34 = vadd.f32 %v2080_v24, %v2079_v22 }
 0x3f6   :  { %1857 = vst [vmem:[#allocation8 + $0x10] sm:$0xff] %v1801_v32  ;;  %v1804_v48 = vadd.f32 %v2081_v34, %v2947_v9 }
 0x3f8   :  { %1858 = vst [vmem:[#allocation8 + $0x18] sm:$0xff] %v1804_v48  ;;  %v2082_v46 = vpop.f32.mrb[72].mxu0 }
 0x3f9   :  { %v2083_v53 = vpop.f32.mrb[73].mxu0 }
 0x3fa   :  { %v2084_v62 = vadd.f32 %v2083_v53, %v2082_v46  ;;  %v2085_v59 = vpop.f32.mrb[74].mxu0 }
 0x3fb   :  { %v2086_v60 = vpop.f32.mrb[75].mxu0 }
 0x3fc   :  { %v1809_v13 = vadd.f32 %v2084_v62, %v2947_v9  ;;  %v2087_v23 = vadd.f32 %v2086_v60, %v2085_v59 }
 0x3fe   :  { %1859 = vst [vmem:[#allocation8 + $0x20] sm:$0xff] %v1809_v13  ;;  %v1812_v0 = vadd.f32 %v2087_v23, %v2947_v9 }
 0x400   :  { %1860 = vst [vmem:[#allocation8 + $0x28] sm:$0xff] %v1812_v0  ;;  %v2088_v6 = vpop.f32.mrb[76].mxu0 }
 0x401   :  { %v2089_v19 = vpop.f32.mrb[77].mxu0 }
 0x402   :  { %v2090_v4 = vadd.f32 %v2089_v19, %v2088_v6  ;;  %v2091_v21 = vpop.f32.mrb[78].mxu0 }
 0x403   :  { %v2092_v25 = vpop.f32.mrb[79].mxu0 }
 0x404   :  { %v1817_v26 = vadd.f32 %v2090_v4, %v2947_v9  ;;  %v2093_v28 = vadd.f32 %v2092_v25, %v2091_v21 }
 0x406   :  { %1861 = vst [vmem:[#allocation8 + $0x30] sm:$0xff] %v1817_v26  ;;  %v1820_v30 = vadd.f32 %v2093_v28, %v2947_v9 }
 0x408   :  { %1862 = vst [vmem:[#allocation8 + $0x38] sm:$0xff] %v1820_v30  ;;  %v2094_v33 = vpop.f32.mrb[80].mxu0 }
 0x409   :  { %v2095_v41 = vpop.f32.mrb[81].mxu0 }
 0x40a   :  { %v2096_v49 = vadd.f32 %v2095_v41, %v2094_v33  ;;  %v2097_v55 = vpop.f32.mrb[82].mxu0 }
 0x40b   :  { %v2098_v51 = vpop.f32.mrb[83].mxu0 }
 0x40c   :  { %v1825_v3 = vadd.f32 %v2096_v49, %v2947_v9  ;;  %v2099_v11 = vadd.f32 %v2098_v51, %v2097_v55 }
 0x40e   :  { %1863 = vst [vmem:[#allocation8 + $0x40] sm:$0xff] %v1825_v3  ;;  %v1828_v12 = vadd.f32 %v2099_v11, %v2947_v9 }
 0x410   :  { %1864 = vst [vmem:[#allocation8 + $0x48] sm:$0xff] %v1828_v12  ;;  %v2100_v45 = vpop.f32.mrb[84].mxu0 }
 0x411   :  { %v2101_v17 = vpop.f32.mrb[85].mxu0 }
 0x412   :  { %v2102_v20 = vadd.f32 %v2101_v17, %v2100_v45  ;;  %v2103_v29 = vpop.f32.mrb[86].mxu0 }
 0x413   :  { %v2104_v31 = vpop.f32.mrb[87].mxu0 }
 0x414   :  { %v1833_v37 = vadd.f32 %v2102_v20, %v2947_v9  ;;  %v2105_v43 = vadd.f32 %v2104_v31, %v2103_v29 }
 0x416   :  { %1865 = vst [vmem:[#allocation8 + $0x50] sm:$0xff] %v1833_v37  ;;  %v1836_v56 = vadd.f32 %v2105_v43, %v2947_v9 }
 0x418   :  { %1866 = vst [vmem:[#allocation8 + $0x58] sm:$0xff] %v1836_v56  ;;  %v2106_v58 = vpop.f32.mrb[88].mxu0 }
 0x419   :  { %v2107_v63 = vpop.f32.mrb[89].mxu0 }
 0x41a   :  { %v2108_v2 = vadd.f32 %v2107_v63, %v2106_v58  ;;  %v2109_v5 = vpop.f32.mrb[90].mxu0 }
 0x41b   :  { %v2110_v7 = vpop.f32.mrb[91].mxu0 }
 0x41c   :  { %v1841_v27 = vadd.f32 %v2108_v2, %v2947_v9  ;;  %v2111_v15 = vadd.f32 %v2110_v7, %v2109_v5 }
 0x41e   :  { %1867 = vst [vmem:[#allocation8 + $0x60] sm:$0xff] %v1841_v27  ;;  %v1844_v36 = vadd.f32 %v2111_v15, %v2947_v9 }
 0x420   :  { %1868 = vst [vmem:[#allocation8 + $0x68] sm:$0xff] %v1844_v36  ;;  %v2112_v16 = vpop.f32.mrb[92].mxu0 }
 0x421   :  { %v2113_v39 = vpop.f32.mrb[93].mxu0 }
 0x422   :  { %v2114_v18 = vadd.f32 %v2113_v39, %v2112_v16  ;;  %v2115_v44 = vpop.f32.mrb[94].mxu0 }
 0x423   :  { %v2116_v47 = vpop.f32.mrb[95].mxu0 }
 0x424   :  { %v1849_v61 = vadd.f32 %v2114_v18, %v2947_v9  ;;  %v2117_v1 = vadd.f32 %v2116_v47, %v2115_v44 }
 0x426   :  { %1869 = vst [vmem:[#allocation8 + $0x70] sm:$0xff] %v1849_v61  ;;  %v1852_v8 = vadd.f32 %v2117_v1, %v2947_v9 }
 0x428   :  { %1870 = vst [vmem:[#allocation8 + $0x78] sm:$0xff] %v1852_v8 }
 0x429   :  { %2492 = shalt.err (!%p2489_p0)
}
 0x42a   :  { %s2493_s16 = scalar_lea.hbm %s2989_s9, 2048 }
 0x42b   :  { %p2494_p1 = scmp.ne.s32.totalorder %s2989_s9, %s2493_s16  ;;  %p2497_p2 = scmp.lt.u32.totalorder %s2493_s16, %s2989_s9 }
 0x42d   :  { %p2499_p3 = pnand %p2497_p2, %p2494_p1 }
 0x42f   :  { %2502 = shalt.err (!%p2499_p3)
}
 0x430   :  { %1882 = dma.vmem_to_hbm [thread:$0]  %s1877_s13, 2048, %s2989_s9, [#allocation4], %s2510_s19, %s2510_s19, %s2511_s20  }
 0x431   :  { %2507 = dma.done.wait [#allocation4], 2048  }
 0x432   :  { %2508 = vsyncadd [#allocation4], 4294965248 }
 0x433   :  { %1886 = vsyncpa [#allocation3], 1 }
 0x434   :  { %1887 = vsyncpa [#allocation6], 1 }
 0x435   :  { %1888 = vsyncpa [#allocation4], 1 }

</bundles_post_ra>
